<compile_context>
chip_gen: v7x
topology: tpu7x:2x2x1
jax: 0.10.0
libtpu: 0.0.40
codegen_flags: <defaults>
</compile_context>

<pallas_src>
import jax
import jax.numpy as jnp
from jax.experimental import pallas as pl
from jax.experimental.pallas import tpu as pltpu

LANE = 128
SUB = 8
BN_EPS = 1e-5


# ----------------------------------------------------------------------------
# Fused encoder kernel: conv stack (dense form) + 3 FC branches + join,
# all resident in VMEM/vregs.  Weight/bias slabs are sliced with static views.
# ----------------------------------------------------------------------------
def _make_kernel(off, col, n_i1, n_i2, n_xp, n_z):
    def kernel(x_ref, m_ref, c_ref, w1_ref, w2_ref, wp1_ref, wk_ref, s_ref,
               z_ref, xp_ref, i1_ref, i2_ref):
        def row(name):                       # (1, n) f32 slice of the scalar slab
            o, n = off[name]
            return s_ref[:, o:o + n]

        def blk(name):                       # (128, n) bf16 slice of the MXU slab
            o, n = col[name]
            return wk_ref[:, o:o + n]

        def mm(a, w):                        # bf16 MXU operands, f32 accumulation
            return jnp.dot(a.astype(jnp.bfloat16), w,
                           preferred_element_type=jnp.float32)

        relu = lambda v: jnp.maximum(v, 0.0)

        # -- perception convs as exact dense linear maps on the NCHW flatten,
        #    BN folded into the weights, Dropout = identity (eval), ReLU.
        a1 = relu(mm(x_ref[...], w1_ref[...]) + row("b1"))       # (M, 512)
        i1_ref[...] = a1[:, :n_i1]                                # true width
        a2 = relu(mm(a1, w2_ref[...]) + row("b2"))               # (M, 256)
        i2_ref[...] = a2[:, :n_i2]

        # -- perception FC head
        p = relu(mm(a2, wp1_ref[...]) + row("bp1"))
        p = relu(mm(p, blk("wp2")) + row("bp2"))
        xp_ref[...] = p[:, :n_xp]

        # -- measurements FC: the K=1 layer is a VPU broadcast-FMA (no MXU)
        mo = relu(m_ref[...] * row("wm1") + row("bm1"))           # (M,1)*(1,128)
        mo = relu(mm(mo, blk("wm2")) + row("bm2"))

        # -- command FC: the K=4 layer is 4 VPU broadcast-FMAs (no dead-K MXU
        #    pass, wc1 lives in the f32 scalar slab)
        c = c_ref[...]                                            # (M, 4) f32
        o_wc1, _ = off["wc1"]
        ncol = off["bc1"][1]
        pre = row("bc1")
        for k in range(4):
            pre = pre + c[:, k:k + 1] * s_ref[:, o_wc1 + k * ncol:
                                              o_wc1 + (k + 1) * ncol]
        co = relu(pre)
        co = relu(mm(co, blk("wc2")) + row("bc2"))

        # -- Join (mode='cat') + after_process FC: the concat is folded into
        #    per-branch weight blocks, so no in-kernel concatenate is needed.
        # TODO(synk): once M grows, fuse into one K=384 dot (single MXU drain).
        z = (mm(p, blk("wjp")) + mm(mo, blk("wjm")) + mm(co, blk("wjc"))
             + row("bj"))
        z_ref[...] = relu(z)[:, :n_z]

    return kernel


# ----------------------------------------------------------------------------
# One-time (hoisted) weight preprocessing.
# ----------------------------------------------------------------------------
def _round_up(n, m):
    return ((n + m - 1) // m) * m


def _pad_matrix(a, rows, cols, dtype):
    out = jnp.zeros((rows, cols), jnp.float32)
    out = out.at[: a.shape[0], : a.shape[1]].set(a.astype(jnp.float32))
    return out.astype(dtype)


def _pad_bias(b, cols):
    out = jnp.zeros((1, cols), jnp.float32)
    return out.at[0, : b.shape[0]].set(b.astype(jnp.float32))


def _conv_as_dense(w_oihw, hin, win, stride):
    """Exact dense (K, N) operator of a VALID conv acting on the NCHW-flat image.

    Built once at prepare time by convolving the identity basis; each entry of
    the result is an exact copy of a conv-weight entry (no rounding).
    TODO(synk): toy spatial sizes only -- do not scale to 88x200 images.
    """
    cout, cin, _, _ = w_oihw.shape
    din = cin * hin * win
    basis = jnp.eye(din, dtype=jnp.float32).reshape(din, cin, hin, win)
    out = jax.lax.conv_general_dilated(
        basis, w_oihw.astype(jnp.float32), (stride, stride), "VALID",
        dimension_numbers=("NCHW", "OIHW", "NCHW"))
    ho, wo = out.shape[2], out.shape[3]
    return out.reshape(din, cout * ho * wo), ho, wo


def prepare_weights(params, cfg):
    """Fold BN, dense-ify convs, pack weights into a few padded slabs, cast bf16."""
    assert len(params["conv"]) == 2
    assert len(params["perception_fc"]) == 2
    assert len(params["measurements_fc"]) == 2
    assert len(params["command_fc"]) == 2
    assert len(params["join_fc"]) == 1
    bf16 = jnp.bfloat16

    # conv stack -> dense linear operators on the NCHW flatten
    hin = win = cfg["spatial"]
    dense, conv_chw = [], []
    for (wc, bc, (gamma, beta, mean, var)), s in zip(params["conv"], cfg["strides"]):
        scale = gamma * jax.lax.rsqrt(var + BN_EPS)
        w_f = wc * scale[:, None, None, None]          # eval-mode BN fold
        b_f = (bc - mean) * scale + beta
        wd, ho, wo = _conv_as_dense(w_f, hin, win, s)
        bd = jnp.repeat(b_f, ho * wo)                  # bias per (c, h, w) flat slot
        dense.append((wd, bd))
        conv_chw.append((wc.shape[0], ho, wo))
        hin, win = ho, wo

    (w1d, b1d), (w2d, b2d) = dense
    kx, n_i1 = w1d.shape
    _, n_i2 = w2d.shape
    n1p, n2p = _round_up(n_i1, LANE), _round_up(n_i2, LANE)

    (wp1, bp1), (wp2, bp2) = params["perception_fc"]
    (wm1, bm1), (wm2, bm2) = params["measurements_fc"]
    (wc1, bc1), (wc2, bc2) = params["command_fc"]
    (wj, bj), = params["join_fc"]
    assert wp1.shape[0] == n_i2 and wm1.shape[0] == 1 and wc1.shape[0] == 4

    np1 = _round_up(wp1.shape[1], LANE)
    np2 = _round_up(wp2.shape[1], LANE)
    nm1p, nm2p = _round_up(wm1.shape[1], LANE), _round_up(wm2.shape[1], LANE)
    nc1p, nc2p = _round_up(wc1.shape[1], LANE), _round_up(wc2.shape[1], LANE)
    njp = _round_up(wj.shape[1], LANE)
    kk = np1
    # One (kk, .) slab holds every K=128 MXU weight; requires all padded FC
    # hidden widths to coincide (true for this config).
    # TODO(synk): generalize the slabbing when hidden widths differ.
    assert np2 == kk and nm1p == kk and nm2p == kk and nc1p == kk and nc2p == kk

    n_xp, n_m, n_c, n_z = wp2.shape[1], wm2.shape[1], wc2.shape[1], wj.shape[1]
    assert wj.shape[0] == n_xp + n_m + n_c

    # --- K=128 MXU weight slab: [wp2 | wm2 | wc2 | wjp | wjm | wjc] ---------
    blocks = [
        ("wp2", _pad_matrix(wp2, kk, np2, bf16)),
        ("wm2", _pad_matrix(wm2, kk, nm2p, bf16)),
        ("wc2", _pad_matrix(wc2, kk, nc2p, bf16)),
        ("wjp", _pad_matrix(wj[:n_xp], kk, njp, bf16)),
        ("wjm", _pad_matrix(wj[n_xp:n_xp + n_m], kk, njp, bf16)),
        ("wjc", _pad_matrix(wj[n_xp + n_m:], kk, njp, bf16)),
    ]
    col, cur, arrs = {}, 0, []
    for name, a in blocks:
        col[name] = (cur, a.shape[1]); cur += a.shape[1]; arrs.append(a)
    wk = jnp.concatenate(arrs, axis=1)                 # (128, 768) bf16

    # --- f32 scalar slab: every bias + the VPU-path weights (wm1, wc1) ------
    wc1_rows = jnp.zeros((4, nc1p), jnp.float32)
    wc1_rows = wc1_rows.at[:, :wc1.shape[1]].set(wc1.astype(jnp.float32))
    parts = [
        ("b1", _pad_bias(b1d, n1p)), ("b2", _pad_bias(b2d, n2p)),
        ("bp1", _pad_bias(bp1, np1)), ("bp2", _pad_bias(bp2, np2)),
        ("wm1", _pad_matrix(wm1, 1, nm1p, jnp.float32)),
        ("bm1", _pad_bias(bm1, nm1p)), ("bm2", _pad_bias(bm2, nm2p)),
        ("wc1", wc1_rows.reshape(1, 4 * nc1p)),
        ("bc1", _pad_bias(bc1, nc1p)), ("bc2", _pad_bias(bc2, nc2p)),
        ("bj", _pad_bias(bj, njp)),
    ]
    off, cur, arrs = {}, 0, []
    for name, a in parts:
        off[name] = (cur, a.shape[1]); cur += a.shape[1]; arrs.append(a)
    scal = jnp.concatenate(arrs, axis=1)               # (1, 2304) f32

    return {
        "Kx": kx, "n_z": n_z, "n_xp": n_xp, "n_i1": n_i1, "n_i2": n_i2,
        "i1_chw": conv_chw[0], "i2_chw": conv_chw[1],
        # conv layers (dense form; first-layer K kept at its TRUE width so the
        # raw flattened image can be passed without any host-side K padding)
        "w1": _pad_matrix(w1d, kx, n1p, bf16),
        "w2": _pad_matrix(w2d, n1p, n2p, bf16),
        "wp1": _pad_matrix(wp1, n2p, np1, bf16),
        "wk": wk, "col": col,
        "scal": scal, "off": off,
    }


# ----------------------------------------------------------------------------
# Forward wrapper: ONE fused pallas_call; no host-side pads, no output slices.
# ----------------------------------------------------------------------------
def make_encoder_forward(prep):
    kx = prep["Kx"]
    n_z, n_xp, n_i1, n_i2 = prep["n_z"], prep["n_xp"], prep["n_i1"], prep["n_i2"]
    c1, h1, w1s = prep["i1_chw"]
    c2, h2, w2s = prep["i2_chw"]
    weights = (prep["w1"], prep["w2"], prep["wp1"], prep["wk"], prep["scal"])
    kernel = _make_kernel(prep["off"], prep["col"], n_i1, n_i2, n_xp, n_z)

    def _full(shape):
        return pl.BlockSpec(shape, lambda *_: (0,) * len(shape))

    @jax.jit
    def encoder_forward(x_nchw, m, c):
        b = x_nchw.shape[0]
        # x is the only nontrivial wrapper op: flatten (free) + one bf16 cast
        # (halves its HBM->VMEM bytes); m/c pass through at true shapes.
        xf = x_nchw.reshape(b, -1).astype(jnp.bfloat16)
        assert xf.shape[1] == kx, (xf.shape, kx)
        m32 = m.astype(jnp.float32)
        c32 = c.astype(jnp.float32)
        ins = (xf, m32, c32) + weights
        out_shape = (jax.ShapeDtypeStruct((b, n_z), jnp.float32),    # z  (join)
                     jax.ShapeDtypeStruct((b, n_xp), jnp.float32),   # x_perception
                     jax.ShapeDtypeStruct((b, n_i1), jnp.float32),   # inter conv1
                     jax.ShapeDtypeStruct((b, n_i2), jnp.float32))   # inter conv2
        z, xp, i1, i2 = pl.pallas_call(
            kernel,
            out_shape=out_shape,
            grid=(1,),
            in_specs=[_full(a.shape) for a in ins],
            out_specs=tuple(_full(s.shape) for s in out_shape),
            compiler_params=pltpu.CompilerParams(
                dimension_semantics=("arbitrary",)),
        )(*ins)
        # `inter` back to NCHW via contiguous reshapes (flat order is (c,h,w)).
        return z, xp, (i1.reshape(b, c1, h1, w1s), i2.reshape(b, c2, h2, w2s))

    return encoder_forward


def all_forward_encoder(encoder_forward, x_list, m_list, c_list):
    """ALL.forward_encoder: encode frame 0 only -> (f_t, inter). One fused call."""
    f_t, _x_t, inter = encoder_forward(x_list[0], m_list[0], c_list[0])
    return f_t, inter


def encode_frames(encoder_forward, x_list, m_list, c_list):
    """Stack every frame along M and run ONE fused pallas_call (amortizes the
    weight DMA and raises MXU row utilization); split per frame afterwards.
    This is the batched path an ALL.forward-style two-timestep encode uses."""
    n = len(x_list)
    b = x_list[0].shape[0]
    x = jnp.concatenate(x_list, axis=0)
    m = jnp.concatenate(m_list, axis=0)
    c = jnp.concatenate(c_list, axis=0)
    z, xp, (i1, i2) = encoder_forward(x, m, c)
    zs = [z[t * b:(t + 1) * b] for t in range(n)]
    xps = [xp[t * b:(t + 1) * b] for t in range(n)]
    inters = [(i1[t * b:(t + 1) * b], i2[t * b:(t + 1) * b]) for t in range(n)]
    return zs, xps, inters


# ----------------------------------------------------------------------------
# Deterministic synthetic parameters (shapes per the module __init__).
# ----------------------------------------------------------------------------
def _init_linear(key, fan_in, fan_out):
    kw, kb = jax.random.split(key)
    w = jax.random.normal(kw, (fan_in, fan_out), jnp.float32) * 0.1
    b = jax.random.normal(kb, (fan_out,), jnp.float32) * 0.01
    return w, b


def _init_conv(key, cin, cout, k):
    kw, kb = jax.random.split(key)
    w = jax.random.normal(kw, (cout, cin, k, k), jnp.float32) * 0.1
    b = jax.random.normal(kb, (cout,), jnp.float32) * 0.01
    bn = (jnp.ones((cout,), jnp.float32),     # gamma
          jnp.zeros((cout,), jnp.float32),    # beta
          jnp.zeros((cout,), jnp.float32),    # running_mean
          jnp.ones((cout,), jnp.float32))     # running_var
    return w, b, bn


def build_params(key, cfg):
    keys = iter(jax.random.split(key, 64))
    p = {}
    chans = cfg["conv_channels"]
    p["conv"] = [_init_conv(next(keys), chans[i], chans[i + 1], cfg["kernels"][i])
                 for i in range(len(chans) - 1)]
    h = w = cfg["spatial"]
    for k, s in zip(cfg["kernels"], cfg["strides"]):
        h = (h - k) // s + 1
        w = (w - k) // s + 1
    flat = chans[-1] * h * w
    neurons = [flat] + cfg["perception_fc"]
    p["perception_fc"] = [_init_linear(next(keys), neurons[i], neurons[i + 1])
                          for i in range(len(neurons) - 1)]
    neurons = [1] + cfg["measurements_fc"]
    p["measurements_fc"] = [_init_linear(next(keys), neurons[i], neurons[i + 1])
                            for i in range(len(neurons) - 1)]
    neurons = [4] + cfg["command_fc"]
    p["command_fc"] = [_init_linear(next(keys), neurons[i], neurons[i + 1])
                       for i in range(len(neurons) - 1)]
    join_in = cfg["perception_fc"][-1] + cfg["measurements_fc"][-1] + cfg["command_fc"][-1]
    neurons = [join_in] + cfg["join_fc"]
    p["join_fc"] = [_init_linear(next(keys), neurons[i], neurons[i + 1])
                    for i in range(len(neurons) - 1)]
    return p


# ----------------------------------------------------------------------------
# Pure-JAX reference (mirrors Encoder.forward in eval mode, bf16 operands).
# ----------------------------------------------------------------------------
def reference_forward(params, cfg, x_nchw, m, c):
    r = lambda a: a.astype(jnp.bfloat16).astype(jnp.float32)
    x = x_nchw.astype(jnp.float32)
    inter = []
    for (wc, bc, (gamma, beta, mean, var)), s in zip(params["conv"], cfg["strides"]):
        scale = gamma * jax.lax.rsqrt(var + BN_EPS)
        w_f = wc * scale[:, None, None, None]
        b_f = (bc - mean) * scale + beta
        y = jax.lax.conv_general_dilated(
            r(x), r(w_f), (s, s), "VALID",
            dimension_numbers=("NCHW", "OIHW", "NCHW"),
            preferred_element_type=jnp.float32)
        x = jnp.maximum(y + b_f[None, :, None, None], 0.0)
        inter.append(x)
    b = x.shape[0]
    h = x.reshape(b, -1)

    def fc(h, layers):
        for w_, b_ in layers:
            h = jnp.maximum(
                jnp.dot(r(h), r(w_), preferred_element_type=jnp.float32) + b_, 0.0)
        return h

    xp = fc(h, params["perception_fc"])
    mo = fc(m.astype(jnp.float32), params["measurements_fc"])
    co = fc(c.astype(jnp.float32), params["command_fc"])
    z = fc(jnp.concatenate([xp, mo, co], axis=1), params["join_fc"])
    return z, xp, tuple(inter)


def _close(a, b, name):
    err = float(jnp.max(jnp.abs(a - b)))
    scale = float(jnp.max(jnp.abs(b)))
    assert err <= 5e-2 * scale + 1e-3, (name, err, scale)


# ----------------------------------------------------------------------------
if __name__ == "__main__":
    cfg = {
        "spatial": 16,
        "conv_channels": [3, 8, 16],
        "kernels": [3, 3],
        "strides": [2, 2],
        "perception_fc": [64, 32],
        "measurements_fc": [16, 16],
        "command_fc": [16, 16],
        "join_fc": [64],
    }
    key = jax.random.PRNGKey(0)
    k_p, k_x0, k_x1, k_m, k_c = jax.random.split(key, 5)
    params = build_params(k_p, cfg)

    B = 2
    x0 = jax.random.normal(k_x0, (B, 3, cfg["spatial"], cfg["spatial"]), jnp.float32)
    x1 = jax.random.normal(k_x1, (B, 3, cfg["spatial"], cfg["spatial"]), jnp.float32)
    m0 = jax.random.normal(k_m, (B, 1), jnp.float32)
    m1 = m0 + 0.1
    c0 = jax.nn.one_hot(jnp.array([0, 2]), 4, dtype=jnp.float32)
    c1 = jax.nn.one_hot(jnp.array([1, 3]), 4, dtype=jnp.float32)

    prep = prepare_weights(params, cfg)                # one-time hoisted preprocessing
    encoder_fwd = make_encoder_forward(prep)

    # Module path: ALL.forward_encoder (frame 0 only) -- one fused call.
    f_t, inter = all_forward_encoder(encoder_fwd, [x0, x1], [m0, m1], [c0, c1])
    jax.block_until_ready(f_t)
    for t in inter:
        jax.block_until_ready(t)
    assert f_t.shape == (B, cfg["join_fc"][-1]), f_t.shape
    assert inter[0].shape == (B, 8, 7, 7), inter[0].shape
    assert inter[1].shape == (B, 16, 3, 3), inter[1].shape

    # Batched path (perf review): both timesteps stacked along M, ONE fused call.
    z_all, xp_all, inter_all = encode_frames(encoder_fwd, [x0, x1], [m0, m1], [c0, c1])
    jax.block_until_ready(z_all[0])

    # Numerical checks against the pure-JAX reference of the same eval-mode math.
    for t, (x_t, m_t, c_t) in enumerate([(x0, m0, c0), (x1, m1, c1)]):
        z_ref, xp_ref, inter_ref = reference_forward(params, cfg, x_t, m_t, c_t)
        _close(z_all[t], z_ref, f"z[{t}]")
        _close(xp_all[t], xp_ref, f"x_perception[{t}]")
        _close(inter_all[t][0], inter_ref[0], f"inter1[{t}]")
        _close(inter_all[t][1], inter_ref[1], f"inter2[{t}]")

    z_ref0, _, inter_ref0 = reference_forward(params, cfg, x0, m0, c0)
    _close(f_t, z_ref0, "f_t")
    _close(inter[0], inter_ref0[0], "inter[0]")
    _close(inter[1], inter_ref0[1], "inter[1]")

    print("KERNEL_OK")
</pallas_src>

<mosaic_0001>
module attributes {stable_mosaic.version = 11 : i64} {
  func.func @kernel(%arg0: i32, %arg1: memref<2x768xbf16, #tpu.memory_space<vmem>>, %arg2: memref<2x1xf32, #tpu.memory_space<vmem>>, %arg3: memref<2x4xf32, #tpu.memory_space<vmem>>, %arg4: memref<768x512xbf16, #tpu.memory_space<vmem>>, %arg5: memref<512x256xbf16, #tpu.memory_space<vmem>>, %arg6: memref<256x128xbf16, #tpu.memory_space<vmem>>, %arg7: memref<128x768xbf16, #tpu.memory_space<vmem>>, %arg8: memref<1x2304xf32, #tpu.memory_space<vmem>>, %arg9: memref<2x64xf32, #tpu.memory_space<vmem>>, %arg10: memref<2x32xf32, #tpu.memory_space<vmem>>, %arg11: memref<2x392xf32, #tpu.memory_space<vmem>>, %arg12: memref<2x144xf32, #tpu.memory_space<vmem>>) attributes {dimension_semantics = [#tpu.dimension_semantics<arbitrary>], iteration_bounds = array<i64: 1>, scalar_prefetch = 0 : i64, scratch_operands = 0 : i64, tpu.core_type = #tpu.core_type<tc>, window_params = [{pipeline_mode = #tpu.pipeline_mode<synchronous>, transform_indices = @transform_0, window_bounds = array<i64: 2, 768>}, {pipeline_mode = #tpu.pipeline_mode<synchronous>, transform_indices = @transform_1, window_bounds = array<i64: 2, 1>}, {pipeline_mode = #tpu.pipeline_mode<synchronous>, transform_indices = @transform_2, window_bounds = array<i64: 2, 4>}, {pipeline_mode = #tpu.pipeline_mode<synchronous>, transform_indices = @transform_3, window_bounds = array<i64: 768, 512>}, {pipeline_mode = #tpu.pipeline_mode<synchronous>, transform_indices = @transform_4, window_bounds = array<i64: 512, 256>}, {pipeline_mode = #tpu.pipeline_mode<synchronous>, transform_indices = @transform_5, window_bounds = array<i64: 256, 128>}, {pipeline_mode = #tpu.pipeline_mode<synchronous>, transform_indices = @transform_6, window_bounds = array<i64: 128, 768>}, {pipeline_mode = #tpu.pipeline_mode<synchronous>, transform_indices = @transform_7, window_bounds = array<i64: 1, 2304>}, {pipeline_mode = #tpu.pipeline_mode<synchronous>, transform_indices = @transform_8, window_bounds = array<i64: 2, 64>}, {pipeline_mode = #tpu.pipeline_mode<synchronous>, transform_indices = @transform_9, window_bounds = array<i64: 2, 32>}, {pipeline_mode = #tpu.pipeline_mode<synchronous>, transform_indices = @transform_10, window_bounds = array<i64: 2, 392>}, {pipeline_mode = #tpu.pipeline_mode<synchronous>, transform_indices = @transform_11, window_bounds = array<i64: 2, 144>}]} {
    %c0 = arith.constant 0 : index
    %c0_0 = arith.constant 0 : index
    %0 = vector.load %arg1[%c0, %c0_0] : memref<2x768xbf16, #tpu.memory_space<vmem>>, vector<2x768xbf16>
    %c0_1 = arith.constant 0 : index
    %c0_2 = arith.constant 0 : index
    %1 = vector.load %arg4[%c0_1, %c0_2] : memref<768x512xbf16, #tpu.memory_space<vmem>>, vector<768x512xbf16>
    %cst = arith.constant dense<0.000000e+00> : vector<2x512xf32>
    %2 = tpu.matmul %0, %1, %cst {dimension_numbers = #tpu.dot_dimension_numbers<[1], [0], [0], [1], [0, 0, 1, 1], [], []>} : vector<2x768xbf16>, vector<768x512xbf16>, vector<2x512xf32> -> vector<2x512xf32>
    %c0_3 = arith.constant 0 : index
    %c0_4 = arith.constant 0 : index
    %3 = vector.load %arg8[%c0_3, %c0_4] : memref<1x2304xf32, #tpu.memory_space<vmem>>, vector<1x512xf32>
    %4 = vector.broadcast %3 : vector<1x512xf32> to vector<2x512xf32>
    %5 = arith.addf %2, %4 : vector<2x512xf32>
    %cst_5 = arith.constant 0.000000e+00 : f32
    %6 = vector.broadcast %cst_5 : f32 to vector<2x512xf32>
    %7 = arith.maximumf %5, %6 : vector<2x512xf32>
    %8 = vector.extract_strided_slice %7 {offsets = [0, 0], sizes = [2, 392], strides = [1, 1]} : vector<2x512xf32> to vector<2x392xf32>
    %c0_6 = arith.constant 0 : index
    %c0_7 = arith.constant 0 : index
    %9 = vector.load %arg11[%c0_6, %c0_7] : memref<2x392xf32, #tpu.memory_space<vmem>>, vector<2x392xf32>
    tpu.vector_store %arg11[%c0_6, %c0_7], %8 {strides = array<i32>} : memref<2x392xf32, #tpu.memory_space<vmem>>, vector<2x392xf32>,
    %c0_8 = arith.constant 0 : index
    %c0_9 = arith.constant 0 : index
    %10 = vector.load %arg5[%c0_8, %c0_9] : memref<512x256xbf16, #tpu.memory_space<vmem>>, vector<512x256xbf16>
    %11 = arith.truncf %7 : vector<2x512xf32> to vector<2x512xbf16>
    %cst_10 = arith.constant dense<0.000000e+00> : vector<2x256xf32>
    %12 = tpu.matmul %11, %10, %cst_10 {dimension_numbers = #tpu.dot_dimension_numbers<[1], [0], [0], [1], [0, 0, 1, 1], [], []>} : vector<2x512xbf16>, vector<512x256xbf16>, vector<2x256xf32> -> vector<2x256xf32>
    %c0_11 = arith.constant 0 : index
    %c512 = arith.constant 512 : index
    %13 = vector.load %arg8[%c0_11, %c512] : memref<1x2304xf32, #tpu.memory_space<vmem>>, vector<1x256xf32>
    %14 = vector.broadcast %13 : vector<1x256xf32> to vector<2x256xf32>
    %15 = arith.addf %12, %14 : vector<2x256xf32>
    %cst_12 = arith.constant 0.000000e+00 : f32
    %16 = vector.broadcast %cst_12 : f32 to vector<2x256xf32>
    %17 = arith.maximumf %15, %16 : vector<2x256xf32>
    %18 = vector.extract_strided_slice %17 {offsets = [0, 0], sizes = [2, 144], strides = [1, 1]} : vector<2x256xf32> to vector<2x144xf32>
    %c0_13 = arith.constant 0 : index
    %c0_14 = arith.constant 0 : index
    %19 = vector.load %arg12[%c0_13, %c0_14] : memref<2x144xf32, #tpu.memory_space<vmem>>, vector<2x144xf32>
    tpu.vector_store %arg12[%c0_13, %c0_14], %18 {strides = array<i32>} : memref<2x144xf32, #tpu.memory_space<vmem>>, vector<2x144xf32>,
    %c0_15 = arith.constant 0 : index
    %c0_16 = arith.constant 0 : index
    %20 = vector.load %arg6[%c0_15, %c0_16] : memref<256x128xbf16, #tpu.memory_space<vmem>>, vector<256x128xbf16>
    %21 = arith.truncf %17 : vector<2x256xf32> to vector<2x256xbf16>
    %cst_17 = arith.constant dense<0.000000e+00> : vector<2x128xf32>
    %22 = tpu.matmul %21, %20, %cst_17 {dimension_numbers = #tpu.dot_dimension_numbers<[1], [0], [0], [1], [0, 0, 1, 1], [], []>} : vector<2x256xbf16>, vector<256x128xbf16>, vector<2x128xf32> -> vector<2x128xf32>
    %c0_18 = arith.constant 0 : index
    %c768 = arith.constant 768 : index
    %23 = vector.load %arg8[%c0_18, %c768] : memref<1x2304xf32, #tpu.memory_space<vmem>>, vector<1x128xf32>
    %24 = vector.broadcast %23 : vector<1x128xf32> to vector<2x128xf32>
    %25 = arith.addf %22, %24 : vector<2x128xf32>
    %cst_19 = arith.constant 0.000000e+00 : f32
    %26 = vector.broadcast %cst_19 : f32 to vector<2x128xf32>
    %27 = arith.maximumf %25, %26 : vector<2x128xf32>
    %c0_20 = arith.constant 0 : index
    %c0_21 = arith.constant 0 : index
    %28 = vector.load %arg7[%c0_20, %c0_21] : memref<128x768xbf16, #tpu.memory_space<vmem>>, vector<128x128xbf16>
    %29 = arith.truncf %27 : vector<2x128xf32> to vector<2x128xbf16>
    %cst_22 = arith.constant dense<0.000000e+00> : vector<2x128xf32>
    %30 = tpu.matmul %29, %28, %cst_22 {dimension_numbers = #tpu.dot_dimension_numbers<[1], [0], [0], [1], [0, 0, 1, 1], [], []>} : vector<2x128xbf16>, vector<128x128xbf16>, vector<2x128xf32> -> vector<2x128xf32>
    %c0_23 = arith.constant 0 : index
    %c896 = arith.constant 896 : index
    %31 = vector.load %arg8[%c0_23, %c896] : memref<1x2304xf32, #tpu.memory_space<vmem>>, vector<1x128xf32>
    %32 = vector.broadcast %31 : vector<1x128xf32> to vector<2x128xf32>
    %33 = arith.addf %30, %32 : vector<2x128xf32>
    %cst_24 = arith.constant 0.000000e+00 : f32
    %34 = vector.broadcast %cst_24 : f32 to vector<2x128xf32>
    %35 = arith.maximumf %33, %34 : vector<2x128xf32>
    %36 = vector.extract_strided_slice %35 {offsets = [0, 0], sizes = [2, 32], strides = [1, 1]} : vector<2x128xf32> to vector<2x32xf32>
    %c0_25 = arith.constant 0 : index
    %c0_26 = arith.constant 0 : index
    %37 = vector.load %arg10[%c0_25, %c0_26] : memref<2x32xf32, #tpu.memory_space<vmem>>, vector<2x32xf32>
    tpu.vector_store %arg10[%c0_25, %c0_26], %36 {strides = array<i32>} : memref<2x32xf32, #tpu.memory_space<vmem>>, vector<2x32xf32>,
    %c0_27 = arith.constant 0 : index
    %c0_28 = arith.constant 0 : index
    %38 = vector.load %arg2[%c0_27, %c0_28] : memref<2x1xf32, #tpu.memory_space<vmem>>, vector<2x1xf32>
    %c0_29 = arith.constant 0 : index
    %c1024 = arith.constant 1024 : index
    %39 = vector.load %arg8[%c0_29, %c1024] : memref<1x2304xf32, #tpu.memory_space<vmem>>, vector<1x128xf32>
    %40 = vector.broadcast %38 : vector<2x1xf32> to vector<2x128xf32>
    %41 = vector.broadcast %39 : vector<1x128xf32> to vector<2x128xf32>
    %42 = arith.mulf %40, %41 : vector<2x128xf32>
    %c0_30 = arith.constant 0 : index
    %c1152 = arith.constant 1152 : index
    %43 = vector.load %arg8[%c0_30, %c1152] : memref<1x2304xf32, #tpu.memory_space<vmem>>, vector<1x128xf32>
    %44 = vector.broadcast %43 : vector<1x128xf32> to vector<2x128xf32>
    %45 = arith.addf %42, %44 : vector<2x128xf32>
    %cst_31 = arith.constant 0.000000e+00 : f32
    %46 = vector.broadcast %cst_31 : f32 to vector<2x128xf32>
    %47 = arith.maximumf %45, %46 : vector<2x128xf32>
    %c0_32 = arith.constant 0 : index
    %c128 = arith.constant 128 : index
    %48 = vector.load %arg7[%c0_32, %c128] : memref<128x768xbf16, #tpu.memory_space<vmem>>, vector<128x128xbf16>
    %49 = arith.truncf %47 : vector<2x128xf32> to vector<2x128xbf16>
    %cst_33 = arith.constant dense<0.000000e+00> : vector<2x128xf32>
    %50 = tpu.matmul %49, %48, %cst_33 {dimension_numbers = #tpu.dot_dimension_numbers<[1], [0], [0], [1], [0, 0, 1, 1], [], []>} : vector<2x128xbf16>, vector<128x128xbf16>, vector<2x128xf32> -> vector<2x128xf32>
    %c0_34 = arith.constant 0 : index
    %c1280 = arith.constant 1280 : index
    %51 = vector.load %arg8[%c0_34, %c1280] : memref<1x2304xf32, #tpu.memory_space<vmem>>, vector<1x128xf32>
    %52 = vector.broadcast %51 : vector<1x128xf32> to vector<2x128xf32>
    %53 = arith.addf %50, %52 : vector<2x128xf32>
    %cst_35 = arith.constant 0.000000e+00 : f32
    %54 = vector.broadcast %cst_35 : f32 to vector<2x128xf32>
    %55 = arith.maximumf %53, %54 : vector<2x128xf32>
    %c0_36 = arith.constant 0 : index
    %c0_37 = arith.constant 0 : index
    %56 = vector.load %arg3[%c0_36, %c0_37] : memref<2x4xf32, #tpu.memory_space<vmem>>, vector<2x4xf32>
    %c0_38 = arith.constant 0 : index
    %c1920 = arith.constant 1920 : index
    %57 = vector.load %arg8[%c0_38, %c1920] : memref<1x2304xf32, #tpu.memory_space<vmem>>, vector<1x128xf32>
    %58 = vector.extract_strided_slice %56 {offsets = [0, 0], sizes = [2, 1], strides = [1, 1]} : vector<2x4xf32> to vector<2x1xf32>
    %c0_39 = arith.constant 0 : index
    %c1408 = arith.constant 1408 : index
    %59 = vector.load %arg8[%c0_39, %c1408] : memref<1x2304xf32, #tpu.memory_space<vmem>>, vector<1x128xf32>
    %60 = vector.broadcast %58 : vector<2x1xf32> to vector<2x128xf32>
    %61 = vector.broadcast %59 : vector<1x128xf32> to vector<2x128xf32>
    %62 = arith.mulf %60, %61 : vector<2x128xf32>
    %63 = vector.broadcast %57 : vector<1x128xf32> to vector<2x128xf32>
    %64 = arith.addf %63, %62 : vector<2x128xf32>
    %65 = vector.extract_strided_slice %56 {offsets = [0, 1], sizes = [2, 1], strides = [1, 1]} : vector<2x4xf32> to vector<2x1xf32>
    %c0_40 = arith.constant 0 : index
    %c1536 = arith.constant 1536 : index
    %66 = vector.load %arg8[%c0_40, %c1536] : memref<1x2304xf32, #tpu.memory_space<vmem>>, vector<1x128xf32>
    %67 = vector.broadcast %65 : vector<2x1xf32> to vector<2x128xf32>
    %68 = vector.broadcast %66 : vector<1x128xf32> to vector<2x128xf32>
    %69 = arith.mulf %67, %68 : vector<2x128xf32>
    %70 = arith.addf %64, %69 : vector<2x128xf32>
    %71 = vector.extract_strided_slice %56 {offsets = [0, 2], sizes = [2, 1], strides = [1, 1]} : vector<2x4xf32> to vector<2x1xf32>
    %c0_41 = arith.constant 0 : index
    %c1664 = arith.constant 1664 : index
    %72 = vector.load %arg8[%c0_41, %c1664] : memref<1x2304xf32, #tpu.memory_space<vmem>>, vector<1x128xf32>
    %73 = vector.broadcast %71 : vector<2x1xf32> to vector<2x128xf32>
    %74 = vector.broadcast %72 : vector<1x128xf32> to vector<2x128xf32>
    %75 = arith.mulf %73, %74 : vector<2x128xf32>
    %76 = arith.addf %70, %75 : vector<2x128xf32>
    %77 = vector.extract_strided_slice %56 {offsets = [0, 3], sizes = [2, 1], strides = [1, 1]} : vector<2x4xf32> to vector<2x1xf32>
    %c0_42 = arith.constant 0 : index
    %c1792 = arith.constant 1792 : index
    %78 = vector.load %arg8[%c0_42, %c1792] : memref<1x2304xf32, #tpu.memory_space<vmem>>, vector<1x128xf32>
    %79 = vector.broadcast %77 : vector<2x1xf32> to vector<2x128xf32>
    %80 = vector.broadcast %78 : vector<1x128xf32> to vector<2x128xf32>
    %81 = arith.mulf %79, %80 : vector<2x128xf32>
    %82 = arith.addf %76, %81 : vector<2x128xf32>
    %cst_43 = arith.constant 0.000000e+00 : f32
    %83 = vector.broadcast %cst_43 : f32 to vector<2x128xf32>
    %84 = arith.maximumf %82, %83 : vector<2x128xf32>
    %c0_44 = arith.constant 0 : index
    %c256 = arith.constant 256 : index
    %85 = vector.load %arg7[%c0_44, %c256] : memref<128x768xbf16, #tpu.memory_space<vmem>>, vector<128x128xbf16>
    %86 = arith.truncf %84 : vector<2x128xf32> to vector<2x128xbf16>
    %cst_45 = arith.constant dense<0.000000e+00> : vector<2x128xf32>
    %87 = tpu.matmul %86, %85, %cst_45 {dimension_numbers = #tpu.dot_dimension_numbers<[1], [0], [0], [1], [0, 0, 1, 1], [], []>} : vector<2x128xbf16>, vector<128x128xbf16>, vector<2x128xf32> -> vector<2x128xf32>
    %c0_46 = arith.constant 0 : index
    %c2048 = arith.constant 2048 : index
    %88 = vector.load %arg8[%c0_46, %c2048] : memref<1x2304xf32, #tpu.memory_space<vmem>>, vector<1x128xf32>
    %89 = vector.broadcast %88 : vector<1x128xf32> to vector<2x128xf32>
    %90 = arith.addf %87, %89 : vector<2x128xf32>
    %cst_47 = arith.constant 0.000000e+00 : f32
    %91 = vector.broadcast %cst_47 : f32 to vector<2x128xf32>
    %92 = arith.maximumf %90, %91 : vector<2x128xf32>
    %c0_48 = arith.constant 0 : index
    %c384 = arith.constant 384 : index
    %93 = vector.load %arg7[%c0_48, %c384] : memref<128x768xbf16, #tpu.memory_space<vmem>>, vector<128x128xbf16>
    %94 = arith.truncf %35 : vector<2x128xf32> to vector<2x128xbf16>
    %cst_49 = arith.constant dense<0.000000e+00> : vector<2x128xf32>
    %95 = tpu.matmul %94, %93, %cst_49 {dimension_numbers = #tpu.dot_dimension_numbers<[1], [0], [0], [1], [0, 0, 1, 1], [], []>} : vector<2x128xbf16>, vector<128x128xbf16>, vector<2x128xf32> -> vector<2x128xf32>
    %c0_50 = arith.constant 0 : index
    %c512_51 = arith.constant 512 : index
    %96 = vector.load %arg7[%c0_50, %c512_51] : memref<128x768xbf16, #tpu.memory_space<vmem>>, vector<128x128xbf16>
    %97 = arith.truncf %55 : vector<2x128xf32> to vector<2x128xbf16>
    %cst_52 = arith.constant dense<0.000000e+00> : vector<2x128xf32>
    %98 = tpu.matmul %97, %96, %cst_52 {dimension_numbers = #tpu.dot_dimension_numbers<[1], [0], [0], [1], [0, 0, 1, 1], [], []>} : vector<2x128xbf16>, vector<128x128xbf16>, vector<2x128xf32> -> vector<2x128xf32>
    %99 = arith.addf %95, %98 : vector<2x128xf32>
    %c0_53 = arith.constant 0 : index
    %c640 = arith.constant 640 : index
    %100 = vector.load %arg7[%c0_53, %c640] : memref<128x768xbf16, #tpu.memory_space<vmem>>, vector<128x128xbf16>
    %101 = arith.truncf %92 : vector<2x128xf32> to vector<2x128xbf16>
    %cst_54 = arith.constant dense<0.000000e+00> : vector<2x128xf32>
    %102 = tpu.matmul %101, %100, %cst_54 {dimension_numbers = #tpu.dot_dimension_numbers<[1], [0], [0], [1], [0, 0, 1, 1], [], []>} : vector<2x128xbf16>, vector<128x128xbf16>, vector<2x128xf32> -> vector<2x128xf32>
    %103 = arith.addf %99, %102 : vector<2x128xf32>
    %c0_55 = arith.constant 0 : index
    %c2176 = arith.constant 2176 : index
    %104 = vector.load %arg8[%c0_55, %c2176] : memref<1x2304xf32, #tpu.memory_space<vmem>>, vector<1x128xf32>
    %105 = vector.broadcast %104 : vector<1x128xf32> to vector<2x128xf32>
    %106 = arith.addf %103, %105 : vector<2x128xf32>
    %cst_56 = arith.constant 0.000000e+00 : f32
    %107 = vector.broadcast %cst_56 : f32 to vector<2x128xf32>
    %108 = arith.maximumf %106, %107 : vector<2x128xf32>
    %109 = vector.extract_strided_slice %108 {offsets = [0, 0], sizes = [2, 64], strides = [1, 1]} : vector<2x128xf32> to vector<2x64xf32>
    %c0_57 = arith.constant 0 : index
    %c0_58 = arith.constant 0 : index
    %110 = vector.load %arg9[%c0_57, %c0_58] : memref<2x64xf32, #tpu.memory_space<vmem>>, vector<2x64xf32>
    tpu.vector_store %arg9[%c0_57, %c0_58], %109 {strides = array<i32>} : memref<2x64xf32, #tpu.memory_space<vmem>>, vector<2x64xf32>,
    return
  }
  func.func @transform_0(%arg0: i32) -> (i32, i32) {
    %c0_i32 = arith.constant 0 : i32
    %c0_i32_0 = arith.constant 0 : i32
    %c0_i32_1 = arith.constant 0 : i32
    return %c0_i32, %c0_i32_0 : i32, i32
  }
  func.func @transform_1(%arg0: i32) -> (i32, i32) {
    %c0_i32 = arith.constant 0 : i32
    %c0_i32_0 = arith.constant 0 : i32
    %c0_i32_1 = arith.constant 0 : i32
    return %c0_i32, %c0_i32_0 : i32, i32
  }
  func.func @transform_2(%arg0: i32) -> (i32, i32) {
    %c0_i32 = arith.constant 0 : i32
    %c0_i32_0 = arith.constant 0 : i32
    %c0_i32_1 = arith.constant 0 : i32
    return %c0_i32, %c0_i32_0 : i32, i32
  }
  func.func @transform_3(%arg0: i32) -> (i32, i32) {
    %c0_i32 = arith.constant 0 : i32
    %c0_i32_0 = arith.constant 0 : i32
    %c0_i32_1 = arith.constant 0 : i32
    return %c0_i32, %c0_i32_0 : i32, i32
  }
  func.func @transform_4(%arg0: i32) -> (i32, i32) {
    %c0_i32 = arith.constant 0 : i32
    %c0_i32_0 = arith.constant 0 : i32
    %c0_i32_1 = arith.constant 0 : i32
    return %c0_i32, %c0_i32_0 : i32, i32
  }
  func.func @transform_5(%arg0: i32) -> (i32, i32) {
    %c0_i32 = arith.constant 0 : i32
    %c0_i32_0 = arith.constant 0 : i32
    %c0_i32_1 = arith.constant 0 : i32
    return %c0_i32, %c0_i32_0 : i32, i32
  }
  func.func @transform_6(%arg0: i32) -> (i32, i32) {
    %c0_i32 = arith.constant 0 : i32
    %c0_i32_0 = arith.constant 0 : i32
    %c0_i32_1 = arith.constant 0 : i32
    return %c0_i32, %c0_i32_0 : i32, i32
  }
  func.func @transform_7(%arg0: i32) -> (i32, i32) {
    %c0_i32 = arith.constant 0 : i32
    %c0_i32_0 = arith.constant 0 : i32
    %c0_i32_1 = arith.constant 0 : i32
    return %c0_i32, %c0_i32_0 : i32, i32
  }
  func.func @transform_8(%arg0: i32) -> (i32, i32) {
    %c0_i32 = arith.constant 0 : i32
    %c0_i32_0 = arith.constant 0 : i32
    %c0_i32_1 = arith.constant 0 : i32
    return %c0_i32, %c0_i32_0 : i32, i32
  }
  func.func @transform_9(%arg0: i32) -> (i32, i32) {
    %c0_i32 = arith.constant 0 : i32
    %c0_i32_0 = arith.constant 0 : i32
    %c0_i32_1 = arith.constant 0 : i32
    return %c0_i32, %c0_i32_0 : i32, i32
  }
  func.func @transform_10(%arg0: i32) -> (i32, i32) {
    %c0_i32 = arith.constant 0 : i32
    %c0_i32_0 = arith.constant 0 : i32
    %c0_i32_1 = arith.constant 0 : i32
    return %c0_i32, %c0_i32_0 : i32, i32
  }
  func.func @transform_11(%arg0: i32) -> (i32, i32) {
    %c0_i32 = arith.constant 0 : i32
    %c0_i32_0 = arith.constant 0 : i32
    %c0_i32_1 = arith.constant 0 : i32
    return %c0_i32, %c0_i32_0 : i32, i32
  }
}

</mosaic_0001>

<bundles_post_ra>
// kernel: encoder_forward.1
= control target key start
LH: loop header
LB: loop body
LE: loop exit
PB: predicated region body
PF: predicated region fallthrough
CT: control target
= control target key end

     0   :  { %17 = vsyncpa [#allocation3], 0  ;;  %v231_v36 = vlaneseq  ;;  %v4075_v37 = vmov 1966171168   ;;  %s5288_s0 = inlined_call_operand.vmem [shape: bf16[2,768], index: 0, kind: input, shape index: {}]   ;;  %s5289_s1 = inlined_call_operand.vmem [shape: f32[2,1], index: 1, kind: input, shape index: {}]   ;;  %s5290_s2 = inlined_call_operand.vmem [shape: f32[2,4], index: 2, kind: input, shape index: {}]   ;;  %s5291_s3 = inlined_call_operand.vmem [shape: bf16[768,512], index: 3, kind: input, shape index: {}]   ;;  %s5292_s4 = inlined_call_operand.vmem [shape: bf16[512,256], index: 4, kind: input, shape index: {}]   ;;  %s5293_s5 = inlined_call_operand.vmem [shape: bf16[256,128], index: 5, kind: input, shape index: {}]   ;;  %s5294_s6 = inlined_call_operand.vmem [shape: bf16[128,768], index: 6, kind: input, shape index: {}]   ;;  %s5295_s7 = inlined_call_operand.vmem [shape: f32[1,2304], index: 7, kind: input, shape index: {}]   ;;  %s5296_s8 = inlined_call_operand.hbm [shape: f32[2,64], index: 8, kind: output, shape index: {0}]   ;;  %s5297_s9 = inlined_call_operand.hbm [shape: f32[2,32], index: 9, kind: output, shape index: {1}]   ;;  %s5298_s10 = inlined_call_operand.vmem [shape: f32[2,392], index: 10, kind: output, shape index: {2}]   ;;  %s5299_s11 = inlined_call_operand.vmem [shape: f32[2,144], index: 11, kind: output, shape index: {3}]  }
   0x1   :  { %v3578_v0 = vld [vmem:[%s5291_s3 + $0x4] ss:$16 sps:$4 sm:$0xff]   ;;  %v3580_v1 = vld [vmem:[%s5291_s3 + $0xc] ss:$16 sps:$4 sm:$0xff]   ;;  %v3582_v2 = vld [vmem:[%s5291_s3] ss:$16 sps:$4 sm:$0xff]   ;;  %v254_v38 = vunpack.c.l.s4 %v4075_v37 }
   0x2   :  { %1265 = vmatprep.subr.bf16.mxu0 %v3578_v0  ;;  %v3583_v3 = vld [vmem:[%s5291_s3 + $0x8] ss:$16 sps:$4 sm:$0xff]   ;;  %1388 = vmatprep.subr.bf16.mxu1 %v3580_v1  ;;  %v3584_v4 = vld [vmem:[%s5291_s3 + $0x24] ss:$16 sps:$4 sm:$0xff]   ;;  %v3586_v5 = vld [vmem:[%s5291_s3 + $0x2c] ss:$16 sps:$4 sm:$0xff]  }
   0x3   :  { %1266 = vmatpush1.bf16.msra.mxu0 %v3582_v2  ;;  %1389 = vmatpush1.bf16.msra.mxu1 %v3583_v3  ;;  %v3588_v6 = vld [vmem:[%s5291_s3 + $0x20] ss:$16 sps:$4 sm:$0xff]   ;;  %v3589_v7 = vld [vmem:[%s5291_s3 + $0x28] ss:$16 sps:$4 sm:$0xff]   ;;  %v3590_v8 = vld [vmem:[%s5291_s3 + $0x44] ss:$16 sps:$4 sm:$0xff]   ;;  %v255_v43 = vunpack.c.0.s8 %v254_v38 }
   0x4   :  { %1267 = vmatprep.subr.bf16.mxu0 %v3584_v4  ;;  %1390 = vmatprep.subr.bf16.mxu1 %v3586_v5  ;;  %v3592_v9 = vld [vmem:[%s5291_s3 + $0x4c] ss:$16 sps:$4 sm:$0xff]   ;;  %v3594_v10 = vld [vmem:[%s5291_s3 + $0x40] ss:$16 sps:$4 sm:$0xff]   ;;  %v3595_v11 = vld [vmem:[%s5291_s3 + $0x48] ss:$16 sps:$4 sm:$0xff]  }
   0x5   :  { %v3596_v12 = vld [vmem:[%s5291_s3 + $0x64] ss:$16 sps:$4 sm:$0xff]   ;;  %v3598_v13 = vld [vmem:[%s5291_s3 + $0x6c] ss:$16 sps:$4 sm:$0xff]   ;;  %v3600_v14 = vld [vmem:[%s5291_s3 + $0x60] ss:$16 sps:$4 sm:$0xff]  }
   0x6   :  { %v3601_v15 = vld [vmem:[%s5291_s3 + $0x68] ss:$16 sps:$4 sm:$0xff]   ;;  %v3602_v16 = vld [vmem:[%s5291_s3 + $0x84] ss:$16 sps:$4 sm:$0xff]   ;;  %v3604_v17 = vld [vmem:[%s5291_s3 + $0x8c] ss:$16 sps:$4 sm:$0xff]  }
   0x7   :  { %1268 = vmatpush1.bf16.msra.mxu0 %v3588_v6  ;;  %1391 = vmatpush1.bf16.msra.mxu1 %v3589_v7  ;;  %v3606_v18 = vld [vmem:[%s5291_s3 + $0x80] ss:$16 sps:$4 sm:$0xff]   ;;  %v3607_v19 = vld [vmem:[%s5291_s3 + $0x88] ss:$16 sps:$4 sm:$0xff]   ;;  %v3608_v20 = vld [vmem:[%s5291_s3 + $0xa4] ss:$16 sps:$4 sm:$0xff]  }
   0x8   :  { %1269 = vmatprep.subr.bf16.mxu0 %v3590_v8  ;;  %1392 = vmatprep.subr.bf16.mxu1 %v3592_v9  ;;  %v3610_v21 = vld [vmem:[%s5291_s3 + $0xac] ss:$16 sps:$4 sm:$0xff]   ;;  %v3612_v22 = vld [vmem:[%s5291_s3 + $0xa0] ss:$16 sps:$4 sm:$0xff]   ;;  %v3613_v23 = vld [vmem:[%s5291_s3 + $0xa8] ss:$16 sps:$4 sm:$0xff]  }
   0x9   :  { %v3614_v24 = vld [vmem:[%s5291_s3 + $0xc4] ss:$16 sps:$4 sm:$0xff]   ;;  %v3616_v25 = vld [vmem:[%s5291_s3 + $0xcc] ss:$16 sps:$4 sm:$0xff]   ;;  %v3618_v26 = vld [vmem:[%s5291_s3 + $0xc0] ss:$16 sps:$4 sm:$0xff]  }
   0xa   :  { %v3619_v27 = vld [vmem:[%s5291_s3 + $0xc8] ss:$16 sps:$4 sm:$0xff]   ;;  %v3620_v28 = vld [vmem:[%s5291_s3 + $0xe4] ss:$16 sps:$4 sm:$0xff]   ;;  %v3622_v29 = vld [vmem:[%s5291_s3 + $0xec] ss:$16 sps:$4 sm:$0xff]  }
   0xb   :  { %1270 = vmatpush1.bf16.msra.mxu0 %v3594_v10  ;;  %1393 = vmatpush1.bf16.msra.mxu1 %v3595_v11  ;;  %v3624_v30 = vld [vmem:[%s5291_s3 + $0xe0] ss:$16 sps:$4 sm:$0xff]   ;;  %v3625_v31 = vld [vmem:[%s5291_s3 + $0xe8] ss:$16 sps:$4 sm:$0xff]   ;;  %v3626_v32 = vld [vmem:[%s5291_s3 + $0x104] ss:$16 sps:$4 sm:$0xff]  }
   0xc   :  { %1271 = vmatprep.subr.bf16.mxu0 %v3596_v12  ;;  %1394 = vmatprep.subr.bf16.mxu1 %v3598_v13  ;;  %v3628_v33 = vld [vmem:[%s5291_s3 + $0x10c] ss:$16 sps:$4 sm:$0xff]   ;;  %v3630_v34 = vld [vmem:[%s5291_s3 + $0x100] ss:$16 sps:$4 sm:$0xff]   ;;  %v3631_v35 = vld [vmem:[%s5291_s3 + $0x108] ss:$16 sps:$4 sm:$0xff]  }
   0xd   :  { %v3632_v39 = vld [vmem:[%s5291_s3 + $0x124] ss:$16 sps:$4 sm:$0xff]   ;;  %v3634_v40 = vld [vmem:[%s5291_s3 + $0x12c] ss:$16 sps:$4 sm:$0xff]   ;;  %v3636_v41 = vld [vmem:[%s5291_s3 + $0x120] ss:$16 sps:$4 sm:$0xff]  }
   0xe   :  { %v4262_v42 = vshrl.u32 %v231_v36, 7  ;;  %v3637_v44 = vld [vmem:[%s5291_s3 + $0x128] ss:$16 sps:$4 sm:$0xff]   ;;  %v3638_v45 = vld [vmem:[%s5291_s3 + $0x144] ss:$16 sps:$4 sm:$0xff]  }
   0xf   :  { %1272 = vmatpush1.bf16.msra.mxu0 %v3600_v14  ;;  %1395 = vmatpush1.bf16.msra.mxu1 %v3601_v15  ;;  %v3640_v46 = vld [vmem:[%s5291_s3 + $0x14c] ss:$16 sps:$4 sm:$0xff]   ;;  %v3642_v47 = vld [vmem:[%s5291_s3 + $0x140] ss:$16 sps:$4 sm:$0xff]   ;;  %v3643_v48 = vld [vmem:[%s5291_s3 + $0x148] ss:$16 sps:$4 sm:$0xff]  }
  0x10   :  { %1273 = vmatprep.subr.bf16.mxu0 %v3602_v16  ;;  %1396 = vmatprep.subr.bf16.mxu1 %v3604_v17  ;;  %v258_v49 = vsub.s32 %v255_v43, %v4262_v42  ;;  %v3644_v50 = vld [vmem:[%s5291_s3 + $0x164] ss:$16 sps:$4 sm:$0xff]   ;;  %v3646_v51 = vld [vmem:[%s5291_s3 + $0x16c] ss:$16 sps:$4 sm:$0xff]   ;;  %v3648_v53 = vld [vmem:[%s5291_s3 + $0x160] ss:$16 sps:$4 sm:$0xff]  }
  0x11   :  { %v36_v52 = vld [vmem:[%s5288_s0] sm:$0x3f]  ;;  %v3649_v55 = vld [vmem:[%s5291_s3 + $0x168] ss:$16 sps:$4 sm:$0xff]   ;;  %v3652_v57 = vld [vmem:[%s5291_s3 + $0x18c] ss:$16 sps:$4 sm:$0xff]  }
  0x12   :  { %v259_v54 = vrot.slane %v36_v52, %v258_v49  ;;  %v3650_v56 = vld [vmem:[%s5291_s3 + $0x184] ss:$16 sps:$4 sm:$0xff]   ;;  %v3654_v59 = vld [vmem:[%s5291_s3 + $0x180] ss:$16 sps:$4 sm:$0xff]   ;;  %v3655_v61 = vld [vmem:[%s5291_s3 + $0x188] ss:$16 sps:$4 sm:$0xff]   ;;  %v252_v8 = vcombine.high %v36_v52, %v36_v52 }
  0x13   :  { %1274 = vmatpush1.bf16.msra.mxu0 %v3606_v18  ;;  %1397 = vmatpush1.bf16.msra.mxu1 %v3607_v19  ;;  %v3656_v62 = vld [vmem:[%s5291_s3 + $0x1a4] ss:$16 sps:$4 sm:$0xff]   ;;  %v3658_v63 = vld [vmem:[%s5291_s3 + $0x1ac] ss:$16 sps:$4 sm:$0xff]   ;;  %v3660_v0 = vld [vmem:[%s5291_s3 + $0x1a0] ss:$16 sps:$4 sm:$0xff]  }
  0x14   :  { %1275 = vmatprep.subr.bf16.mxu0 %v3608_v20  ;;  %1398 = vmatprep.subr.bf16.mxu1 %v3610_v21  ;;  %v267_v58 = vcombine.high %v259_v54, %v259_v54  ;;  %v3661_v1 = vld [vmem:[%s5291_s3 + $0x1a8] ss:$16 sps:$4 sm:$0xff]   ;;  %v3662_v2 = vld [vmem:[%s5291_s3 + $0x1c4] ss:$16 sps:$4 sm:$0xff]   ;;  %v3664_v3 = vld [vmem:[%s5291_s3 + $0x1cc] ss:$16 sps:$4 sm:$0xff]   ;;  %v266_v11 = vrot.slane %v252_v8, %v258_v49  ;;  %v4352_v16 = vrot.slane %v259_v54, %v258_v49 }
  0x15   :  { %v3666_v4 = vld [vmem:[%s5291_s3 + $0x1c0] ss:$16 sps:$4 sm:$0xff]   ;;  %v3667_v5 = vld [vmem:[%s5291_s3 + $0x1c8] ss:$16 sps:$4 sm:$0xff]   ;;  %v3668_v6 = vld [vmem:[%s5291_s3 + $0x1e4] ss:$16 sps:$4 sm:$0xff]  }
  0x16   :  { %v289_v60 = vrot.slane %v267_v58, %v258_v49  ;;  %v3670_v7 = vld [vmem:[%s5291_s3 + $0x1ec] ss:$16 sps:$4 sm:$0xff]   ;;  %v3672_v9 = vld [vmem:[%s5291_s3 + $0x1e0] ss:$16 sps:$4 sm:$0xff]   ;;  %v3673_v10 = vld [vmem:[%s5291_s3 + $0x1e8] ss:$16 sps:$4 sm:$0xff]   ;;  %v268_v14 = vcombine.high %v266_v11, %v266_v11  ;;  %v4359_v19 = vrot.slane %v266_v11, %v258_v49 }
  0x17   :  { %1276 = vmatpush1.bf16.msra.mxu0 %v3612_v22  ;;  %1399 = vmatpush1.bf16.msra.mxu1 %v3613_v23  ;;  %v3676_v12 = vld [vmem:[%s5291_s3 + $0x204] ss:$16 sps:$4 sm:$0xff]   ;;  %v3679_v13 = vld [vmem:[%s5291_s3 + $0x20c] ss:$16 sps:$4 sm:$0xff]   ;;  %v3674_v15 = vld [vmem:[%s5291_s3 + $0x200] ss:$16 sps:$4 sm:$0xff]  }
  0x18   :  { %1277 = vmatprep.subr.bf16.mxu0 %v3614_v24  ;;  %1400 = vmatprep.subr.bf16.mxu1 %v3616_v25  ;;  %v3677_v17 = vld [vmem:[%s5291_s3 + $0x208] ss:$16 sps:$4 sm:$0xff]   ;;  %v4357_v18 = vrot.slane %v268_v14, %v258_v49  ;;  %v3682_v20 = vld [vmem:[%s5291_s3 + $0x224] ss:$16 sps:$4 sm:$0xff]   ;;  %v3685_v21 = vld [vmem:[%s5291_s3 + $0x22c] ss:$16 sps:$4 sm:$0xff]   ;;  %v298_v22 = vcombine.high %v289_v60, %v289_v60 }
  0x19   :  { %1297 = vmatprep.mubr.bf16.mxu0 %v289_v60  ;;  %1420 = vmatprep.mubr.bf16.mxu1 %v289_v60  ;;  %v3680_v23 = vld [vmem:[%s5291_s3 + $0x220] ss:$16 sps:$4 sm:$0xff]   ;;  %v3683_v24 = vld [vmem:[%s5291_s3 + $0x228] ss:$16 sps:$4 sm:$0xff]   ;;  %v3688_v25 = vld [vmem:[%s5291_s3 + $0x244] ss:$16 sps:$4 sm:$0xff]  }
  0x1a   :  { %v3701_v36 = vld [vmem:[%s5291_s3 + $0x288] ss:$16 sps:$4 sm:$0xff]   ;;  %v3706_v37 = vld [vmem:[%s5291_s3 + $0x2a4] ss:$16 sps:$4 sm:$0xff]   ;;  %v3709_v38 = vld [vmem:[%s5291_s3 + $0x2ac] ss:$16 sps:$4 sm:$0xff]  }
  0x1b   :  { %1278 = vmatpush1.bf16.msra.mxu0 %v3618_v26  ;;  %1401 = vmatpush1.bf16.msra.mxu1 %v3619_v27  ;;  %v3691_v26 = vld [vmem:[%s5291_s3 + $0x24c] ss:$16 sps:$4 sm:$0xff]   ;;  %v3686_v27 = vld [vmem:[%s5291_s3 + $0x240] ss:$16 sps:$4 sm:$0xff]   ;;  %v3719_v49 = vld [vmem:[%s5291_s3 + $0x2e8] ss:$16 sps:$4 sm:$0xff]  }
  0x1c   :  { %1279 = vmatprep.subr.bf16.mxu0 %v3620_v28  ;;  %1402 = vmatprep.subr.bf16.mxu1 %v3622_v29  ;;  %v3689_v28 = vld [vmem:[%s5291_s3 + $0x248] ss:$16 sps:$4 sm:$0xff]   ;;  %v3694_v29 = vld [vmem:[%s5291_s3 + $0x264] ss:$16 sps:$4 sm:$0xff]   ;;  %v3715_v43 = vld [vmem:[%s5291_s3 + $0x2cc] ss:$16 sps:$4 sm:$0xff]  }
  0x1d   :  { %v3722_v52 = vld [vmem:[%s5291_s3 + $0x300] ss:$16 sps:$4 sm:$0xff]   ;;  %v3730_v54 = vld [vmem:[%s5291_s3 + $0x324] ss:$16 sps:$4 sm:$0xff]   ;;  %v3763_v11 = vld [vmem:[%s5291_s3 + $0x3cc] ss:$16 sps:$4 sm:$0xff]  }
  0x1e   :  { %v3736_v58 = vld [vmem:[%s5291_s3 + $0x344] ss:$16 sps:$4 sm:$0xff]   ;;  %v3734_v60 = vld [vmem:[%s5291_s3 + $0x340] ss:$16 sps:$4 sm:$0xff]  }
  0x1f   :  { %1280 = vmatpush1.bf16.msra.mxu0 %v3624_v30  ;;  %1403 = vmatpush1.bf16.msra.mxu1 %v3625_v31  ;;  %v3697_v30 = vld [vmem:[%s5291_s3 + $0x26c] ss:$16 sps:$4 sm:$0xff]   ;;  %v3692_v31 = vld [vmem:[%s5291_s3 + $0x260] ss:$16 sps:$4 sm:$0xff]   ;;  %v3766_v14 = vld [vmem:[%s5291_s3 + $0x3e4] ss:$16 sps:$4 sm:$0xff]  }
  0x20   :  { %1281 = vmatprep.subr.bf16.mxu0 %v3626_v32  ;;  %1404 = vmatprep.subr.bf16.mxu1 %v3628_v33  ;;  %v3695_v32 = vld [vmem:[%s5291_s3 + $0x268] ss:$16 sps:$4 sm:$0xff]   ;;  %v3700_v33 = vld [vmem:[%s5291_s3 + $0x284] ss:$16 sps:$4 sm:$0xff]   ;;  %v3752_v8 = vld [vmem:[%s5291_s3 + $0x3a0] ss:$16 sps:$4 sm:$0xff]  }
  0x23   :  { %1282 = vmatpush1.bf16.msra.mxu0 %v3630_v34  ;;  %1405 = vmatpush1.bf16.msra.mxu1 %v3631_v35  ;;  %v3703_v34 = vld [vmem:[%s5291_s3 + $0x28c] ss:$16 sps:$4 sm:$0xff]   ;;  %v3698_v35 = vld [vmem:[%s5291_s3 + $0x280] ss:$16 sps:$4 sm:$0xff]  }
  0x24   :  { %1283 = vmatprep.subr.bf16.mxu0 %v3632_v39  ;;  %1406 = vmatprep.subr.bf16.mxu1 %v3634_v40  ;;  %v3704_v39 = vld [vmem:[%s5291_s3 + $0x2a0] ss:$16 sps:$4 sm:$0xff]   ;;  %v3707_v40 = vld [vmem:[%s5291_s3 + $0x2a8] ss:$16 sps:$4 sm:$0xff]  }
  0x27   :  { %1284 = vmatpush1.bf16.msra.mxu0 %v3636_v41  ;;  %1407 = vmatpush1.bf16.msra.mxu1 %v3637_v44  ;;  %v3712_v41 = vld [vmem:[%s5291_s3 + $0x2c4] ss:$16 sps:$4 sm:$0xff]   ;;  %v3710_v44 = vld [vmem:[%s5291_s3 + $0x2c0] ss:$16 sps:$4 sm:$0xff]  }
  0x28   :  { %1285 = vmatprep.subr.bf16.mxu0 %v3638_v45  ;;  %1408 = vmatprep.subr.bf16.mxu1 %v3640_v46  ;;  %v3713_v45 = vld [vmem:[%s5291_s3 + $0x2c8] ss:$16 sps:$4 sm:$0xff]   ;;  %v3718_v46 = vld [vmem:[%s5291_s3 + $0x2e4] ss:$16 sps:$4 sm:$0xff]  }
  0x2b   :  { %1286 = vmatpush1.bf16.msra.mxu0 %v3642_v47  ;;  %1409 = vmatpush1.bf16.msra.mxu1 %v3643_v48  ;;  %v3721_v47 = vld [vmem:[%s5291_s3 + $0x2ec] ss:$16 sps:$4 sm:$0xff]   ;;  %v3716_v48 = vld [vmem:[%s5291_s3 + $0x2e0] ss:$16 sps:$4 sm:$0xff]  }
  0x2c   :  { %1287 = vmatprep.subr.bf16.mxu0 %v3644_v50  ;;  %1410 = vmatprep.subr.bf16.mxu1 %v3646_v51  ;;  %v3724_v50 = vld [vmem:[%s5291_s3 + $0x304] ss:$16 sps:$4 sm:$0xff]   ;;  %v3727_v51 = vld [vmem:[%s5291_s3 + $0x30c] ss:$16 sps:$4 sm:$0xff]  }
  0x2f   :  { %1288 = vmatpush1.bf16.msra.mxu0 %v3648_v53  ;;  %1411 = vmatpush1.bf16.msra.mxu1 %v3649_v55  ;;  %v3725_v53 = vld [vmem:[%s5291_s3 + $0x308] ss:$16 sps:$4 sm:$0xff]   ;;  %v3733_v55 = vld [vmem:[%s5291_s3 + $0x32c] ss:$16 sps:$4 sm:$0xff]  }
  0x30   :  { %1289 = vmatprep.subr.bf16.mxu0 %v3650_v56  ;;  %1412 = vmatprep.subr.bf16.mxu1 %v3652_v57  ;;  %v3728_v56 = vld [vmem:[%s5291_s3 + $0x320] ss:$16 sps:$4 sm:$0xff]   ;;  %v3731_v57 = vld [vmem:[%s5291_s3 + $0x328] ss:$16 sps:$4 sm:$0xff]  }
  0x33   :  { %1290 = vmatpush1.bf16.msra.mxu0 %v3654_v59  ;;  %1413 = vmatpush1.bf16.msra.mxu1 %v3655_v61  ;;  %v3739_v59 = vld [vmem:[%s5291_s3 + $0x34c] ss:$16 sps:$4 sm:$0xff]   ;;  %v3737_v61 = vld [vmem:[%s5291_s3 + $0x348] ss:$16 sps:$4 sm:$0xff]  }
  0x34   :  { %1291 = vmatprep.subr.bf16.mxu0 %v3656_v62  ;;  %1414 = vmatprep.subr.bf16.mxu1 %v3658_v63  ;;  %v3742_v62 = vld [vmem:[%s5291_s3 + $0x364] ss:$16 sps:$4 sm:$0xff]   ;;  %v3745_v63 = vld [vmem:[%s5291_s3 + $0x36c] ss:$16 sps:$4 sm:$0xff]  }
  0x37   :  { %1292 = vmatpush1.bf16.msra.mxu0 %v3660_v0  ;;  %1415 = vmatpush1.bf16.msra.mxu1 %v3661_v1  ;;  %v3740_v0 = vld [vmem:[%s5291_s3 + $0x360] ss:$16 sps:$4 sm:$0xff]   ;;  %v3743_v1 = vld [vmem:[%s5291_s3 + $0x368] ss:$16 sps:$4 sm:$0xff]  }
  0x38   :  { %1293 = vmatprep.subr.bf16.mxu0 %v3662_v2  ;;  %1416 = vmatprep.subr.bf16.mxu1 %v3664_v3  ;;  %v3748_v2 = vld [vmem:[%s5291_s3 + $0x384] ss:$16 sps:$4 sm:$0xff]   ;;  %v3751_v3 = vld [vmem:[%s5291_s3 + $0x38c] ss:$16 sps:$4 sm:$0xff]  }
  0x3b   :  { %1294 = vmatpush1.bf16.msra.mxu0 %v3666_v4  ;;  %1417 = vmatpush1.bf16.msra.mxu1 %v3667_v5  ;;  %v3746_v4 = vld [vmem:[%s5291_s3 + $0x380] ss:$16 sps:$4 sm:$0xff]   ;;  %v3749_v5 = vld [vmem:[%s5291_s3 + $0x388] ss:$16 sps:$4 sm:$0xff]  }
  0x3c   :  { %1295 = vmatprep.subr.bf16.mxu0 %v3668_v6  ;;  %1418 = vmatprep.subr.bf16.mxu1 %v3670_v7  ;;  %v3754_v6 = vld [vmem:[%s5291_s3 + $0x3a4] ss:$16 sps:$4 sm:$0xff]   ;;  %v3757_v7 = vld [vmem:[%s5291_s3 + $0x3ac] ss:$16 sps:$4 sm:$0xff]  }
  0x3f   :  { %1296 = vmatpush1.bf16.msra.mxu0 %v3672_v9  ;;  %1419 = vmatpush1.bf16.msra.mxu1 %v3673_v10  ;;  %v3755_v9 = vld [vmem:[%s5291_s3 + $0x3a8] ss:$16 sps:$4 sm:$0xff]   ;;  %v3760_v10 = vld [vmem:[%s5291_s3 + $0x3c4] ss:$16 sps:$4 sm:$0xff]  }
  0x40   :  { %1306 = vmatprep.subr.bf16.mxu0 %v3676_v12  ;;  %1429 = vmatprep.subr.bf16.mxu1 %v3679_v13  ;;  %v3758_v12 = vld [vmem:[%s5291_s3 + $0x3c0] ss:$16 sps:$4 sm:$0xff]   ;;  %v3761_v13 = vld [vmem:[%s5291_s3 + $0x3c8] ss:$16 sps:$4 sm:$0xff]  }
  0x42   :  { %1298 = vmatmul.mubr.bf16.vlgmr.msra.gmra.mrb[0].mxu0 %v4352_v16  ;;  %1421 = vmatmul.mubr.bf16.vlgmr.msra.gmra.mrb[0].mxu1 %v4352_v16 }
  0x43   :  { %1307 = vmatpush1.bf16.msra.mxu0 %v3674_v15  ;;  %1430 = vmatpush1.bf16.msra.mxu1 %v3677_v17  ;;  %v3769_v15 = vld [vmem:[%s5291_s3 + $0x3ec] ss:$16 sps:$4 sm:$0xff]   ;;  %v3764_v17 = vld [vmem:[%s5291_s3 + $0x3e0] ss:$16 sps:$4 sm:$0xff]  }
  0x44   :  { %1308 = vmatprep.subr.bf16.mxu0 %v3682_v20  ;;  %1431 = vmatprep.subr.bf16.mxu1 %v3685_v21  ;;  %v3767_v20 = vld [vmem:[%s5291_s3 + $0x3e8] ss:$16 sps:$4 sm:$0xff]   ;;  %v3772_v21 = vld [vmem:[%s5291_s3 + $0x404] ss:$16 sps:$4 sm:$0xff]  }
  0x45   :  { %1338 = vmatprep.mubr.bf16.mxu0 %v298_v22  ;;  %1461 = vmatprep.mubr.bf16.mxu1 %v298_v22  ;;  %v3775_v22 = vld [vmem:[%s5291_s3 + $0x40c] ss:$16 sps:$4 sm:$0xff]  }
  0x47   :  { %1309 = vmatpush1.bf16.msra.mxu0 %v3680_v23  ;;  %1432 = vmatpush1.bf16.msra.mxu1 %v3683_v24  ;;  %v3770_v23 = vld [vmem:[%s5291_s3 + $0x400] ss:$16 sps:$4 sm:$0xff]   ;;  %v297_v24 = vcombine.high %v4352_v16, %v4352_v16 }
  0x48   :  { %1310 = vmatprep.subr.bf16.mxu0 %v3688_v25  ;;  %1433 = vmatprep.subr.bf16.mxu1 %v3691_v26  ;;  %v3773_v25 = vld [vmem:[%s5291_s3 + $0x408] ss:$16 sps:$4 sm:$0xff]   ;;  %v3778_v26 = vld [vmem:[%s5291_s3 + $0x424] ss:$16 sps:$4 sm:$0xff]   ;;  %v3776_v16 = vld [vmem:[%s5291_s3 + $0x420] ss:$16 sps:$4 sm:$0xff]  }
  0x4b   :  { %1311 = vmatpush1.bf16.msra.mxu0 %v3686_v27  ;;  %1434 = vmatpush1.bf16.msra.mxu1 %v3689_v28  ;;  %v3781_v27 = vld [vmem:[%s5291_s3 + $0x42c] ss:$16 sps:$4 sm:$0xff]   ;;  %v3779_v28 = vld [vmem:[%s5291_s3 + $0x428] ss:$16 sps:$4 sm:$0xff]  }
  0x4c   :  { %1312 = vmatprep.subr.bf16.mxu0 %v3694_v29  ;;  %1435 = vmatprep.subr.bf16.mxu1 %v3697_v30  ;;  %v3784_v29 = vld [vmem:[%s5291_s3 + $0x444] ss:$16 sps:$4 sm:$0xff]   ;;  %v3787_v30 = vld [vmem:[%s5291_s3 + $0x44c] ss:$16 sps:$4 sm:$0xff]  }
  0x4f   :  { %1313 = vmatpush1.bf16.msra.mxu0 %v3692_v31  ;;  %1436 = vmatpush1.bf16.msra.mxu1 %v3695_v32  ;;  %v3782_v31 = vld [vmem:[%s5291_s3 + $0x440] ss:$16 sps:$4 sm:$0xff]   ;;  %v3785_v32 = vld [vmem:[%s5291_s3 + $0x448] ss:$16 sps:$4 sm:$0xff]  }
  0x50   :  { %1314 = vmatprep.subr.bf16.mxu0 %v3700_v33  ;;  %1437 = vmatprep.subr.bf16.mxu1 %v3703_v34  ;;  %v3790_v33 = vld [vmem:[%s5291_s3 + $0x464] ss:$16 sps:$4 sm:$0xff]   ;;  %v3788_v34 = vld [vmem:[%s5291_s3 + $0x460] ss:$16 sps:$4 sm:$0xff]  }
  0x53   :  { %1315 = vmatpush1.bf16.msra.mxu0 %v3698_v35  ;;  %1438 = vmatpush1.bf16.msra.mxu1 %v3701_v36  ;;  %v3791_v35 = vld [vmem:[%s5291_s3 + $0x468] ss:$16 sps:$4 sm:$0xff]   ;;  %v3796_v36 = vld [vmem:[%s5291_s3 + $0x484] ss:$16 sps:$4 sm:$0xff]  }
  0x54   :  { %1316 = vmatprep.subr.bf16.mxu0 %v3706_v37  ;;  %1439 = vmatprep.subr.bf16.mxu1 %v3709_v38  ;;  %v3799_v37 = vld [vmem:[%s5291_s3 + $0x48c] ss:$16 sps:$4 sm:$0xff]   ;;  %v3794_v38 = vld [vmem:[%s5291_s3 + $0x480] ss:$16 sps:$4 sm:$0xff]  }
  0x57   :  { %1317 = vmatpush1.bf16.msra.mxu0 %v3704_v39  ;;  %1440 = vmatpush1.bf16.msra.mxu1 %v3707_v40  ;;  %v3797_v39 = vld [vmem:[%s5291_s3 + $0x488] ss:$16 sps:$4 sm:$0xff]   ;;  %v3802_v40 = vld [vmem:[%s5291_s3 + $0x4a4] ss:$16 sps:$4 sm:$0xff]  }
  0x58   :  { %1318 = vmatprep.subr.bf16.mxu0 %v3712_v41  ;;  %1441 = vmatprep.subr.bf16.mxu1 %v3715_v43  ;;  %v3805_v41 = vld [vmem:[%s5291_s3 + $0x4ac] ss:$16 sps:$4 sm:$0xff]   ;;  %v3800_v43 = vld [vmem:[%s5291_s3 + $0x4a0] ss:$16 sps:$4 sm:$0xff]  }
  0x5b   :  { %1319 = vmatpush1.bf16.msra.mxu0 %v3710_v44  ;;  %1442 = vmatpush1.bf16.msra.mxu1 %v3713_v45  ;;  %v3803_v44 = vld [vmem:[%s5291_s3 + $0x4a8] ss:$16 sps:$4 sm:$0xff]   ;;  %v3808_v45 = vld [vmem:[%s5291_s3 + $0x4c4] ss:$16 sps:$4 sm:$0xff]  }
  0x5c   :  { %1320 = vmatprep.subr.bf16.mxu0 %v3718_v46  ;;  %1443 = vmatprep.subr.bf16.mxu1 %v3721_v47  ;;  %v3811_v46 = vld [vmem:[%s5291_s3 + $0x4cc] ss:$16 sps:$4 sm:$0xff]   ;;  %v3806_v47 = vld [vmem:[%s5291_s3 + $0x4c0] ss:$16 sps:$4 sm:$0xff]  }
  0x5f   :  { %1321 = vmatpush1.bf16.msra.mxu0 %v3716_v48  ;;  %1444 = vmatpush1.bf16.msra.mxu1 %v3719_v49  ;;  %v3809_v48 = vld [vmem:[%s5291_s3 + $0x4c8] ss:$16 sps:$4 sm:$0xff]   ;;  %v3814_v49 = vld [vmem:[%s5291_s3 + $0x4e4] ss:$16 sps:$4 sm:$0xff]  }
  0x60   :  { %1322 = vmatprep.subr.bf16.mxu0 %v3724_v50  ;;  %1445 = vmatprep.subr.bf16.mxu1 %v3727_v51  ;;  %v3817_v50 = vld [vmem:[%s5291_s3 + $0x4ec] ss:$16 sps:$4 sm:$0xff]   ;;  %v3812_v51 = vld [vmem:[%s5291_s3 + $0x4e0] ss:$16 sps:$4 sm:$0xff]  }
  0x63   :  { %1323 = vmatpush1.bf16.msra.mxu0 %v3722_v52  ;;  %1446 = vmatpush1.bf16.msra.mxu1 %v3725_v53  ;;  %v3815_v52 = vld [vmem:[%s5291_s3 + $0x4e8] ss:$16 sps:$4 sm:$0xff]   ;;  %v3820_v53 = vld [vmem:[%s5291_s3 + $0x504] ss:$16 sps:$4 sm:$0xff]  }
  0x64   :  { %1324 = vmatprep.subr.bf16.mxu0 %v3730_v54  ;;  %1447 = vmatprep.subr.bf16.mxu1 %v3733_v55  ;;  %v3823_v54 = vld [vmem:[%s5291_s3 + $0x50c] ss:$16 sps:$4 sm:$0xff]   ;;  %v3818_v55 = vld [vmem:[%s5291_s3 + $0x500] ss:$16 sps:$4 sm:$0xff]  }
  0x67   :  { %1325 = vmatpush1.bf16.msra.mxu0 %v3728_v56  ;;  %1448 = vmatpush1.bf16.msra.mxu1 %v3731_v57  ;;  %v3821_v56 = vld [vmem:[%s5291_s3 + $0x508] ss:$16 sps:$4 sm:$0xff]   ;;  %v3826_v57 = vld [vmem:[%s5291_s3 + $0x524] ss:$16 sps:$4 sm:$0xff]  }
  0x68   :  { %1326 = vmatprep.subr.bf16.mxu0 %v3736_v58  ;;  %1449 = vmatprep.subr.bf16.mxu1 %v3739_v59  ;;  %v3829_v58 = vld [vmem:[%s5291_s3 + $0x52c] ss:$16 sps:$4 sm:$0xff]   ;;  %v3824_v59 = vld [vmem:[%s5291_s3 + $0x520] ss:$16 sps:$4 sm:$0xff]  }
  0x6b   :  { %1327 = vmatpush1.bf16.msra.mxu0 %v3734_v60  ;;  %1450 = vmatpush1.bf16.msra.mxu1 %v3737_v61  ;;  %v3827_v60 = vld [vmem:[%s5291_s3 + $0x528] ss:$16 sps:$4 sm:$0xff]   ;;  %v3832_v61 = vld [vmem:[%s5291_s3 + $0x544] ss:$16 sps:$4 sm:$0xff]  }
  0x6c   :  { %1328 = vmatprep.subr.bf16.mxu0 %v3742_v62  ;;  %1451 = vmatprep.subr.bf16.mxu1 %v3745_v63  ;;  %v3835_v62 = vld [vmem:[%s5291_s3 + $0x54c] ss:$16 sps:$4 sm:$0xff]   ;;  %v3830_v63 = vld [vmem:[%s5291_s3 + $0x540] ss:$16 sps:$4 sm:$0xff]  }
  0x6f   :  { %1329 = vmatpush1.bf16.msra.mxu0 %v3740_v0  ;;  %1452 = vmatpush1.bf16.msra.mxu1 %v3743_v1  ;;  %v3833_v0 = vld [vmem:[%s5291_s3 + $0x548] ss:$16 sps:$4 sm:$0xff]   ;;  %v3838_v1 = vld [vmem:[%s5291_s3 + $0x564] ss:$16 sps:$4 sm:$0xff]  }
  0x70   :  { %1330 = vmatprep.subr.bf16.mxu0 %v3748_v2  ;;  %1453 = vmatprep.subr.bf16.mxu1 %v3751_v3  ;;  %v3841_v2 = vld [vmem:[%s5291_s3 + $0x56c] ss:$16 sps:$4 sm:$0xff]   ;;  %v3836_v3 = vld [vmem:[%s5291_s3 + $0x560] ss:$16 sps:$4 sm:$0xff]  }
  0x73   :  { %1331 = vmatpush1.bf16.msra.mxu0 %v3746_v4  ;;  %1454 = vmatpush1.bf16.msra.mxu1 %v3749_v5  ;;  %v3839_v4 = vld [vmem:[%s5291_s3 + $0x568] ss:$16 sps:$4 sm:$0xff]   ;;  %v3844_v5 = vld [vmem:[%s5291_s3 + $0x584] ss:$16 sps:$4 sm:$0xff]  }
  0x74   :  { %1332 = vmatprep.subr.bf16.mxu0 %v3754_v6  ;;  %1455 = vmatprep.subr.bf16.mxu1 %v3757_v7  ;;  %v3847_v6 = vld [vmem:[%s5291_s3 + $0x58c] ss:$16 sps:$4 sm:$0xff]   ;;  %v3842_v7 = vld [vmem:[%s5291_s3 + $0x580] ss:$16 sps:$4 sm:$0xff]  }
  0x77   :  { %1333 = vmatpush1.bf16.msra.mxu0 %v3752_v8  ;;  %1456 = vmatpush1.bf16.msra.mxu1 %v3755_v9  ;;  %v3845_v8 = vld [vmem:[%s5291_s3 + $0x588] ss:$16 sps:$4 sm:$0xff]   ;;  %v3850_v9 = vld [vmem:[%s5291_s3 + $0x5a4] ss:$16 sps:$4 sm:$0xff]  }
  0x78   :  { %1334 = vmatprep.subr.bf16.mxu0 %v3760_v10  ;;  %1457 = vmatprep.subr.bf16.mxu1 %v3763_v11  ;;  %v3853_v10 = vld [vmem:[%s5291_s3 + $0x5ac] ss:$16 sps:$4 sm:$0xff]   ;;  %v3848_v11 = vld [vmem:[%s5291_s3 + $0x5a0] ss:$16 sps:$4 sm:$0xff]  }
  0x7b   :  { %1335 = vmatpush1.bf16.msra.mxu0 %v3758_v12  ;;  %1458 = vmatpush1.bf16.msra.mxu1 %v3761_v13  ;;  %v3851_v12 = vld [vmem:[%s5291_s3 + $0x5a8] ss:$16 sps:$4 sm:$0xff]   ;;  %v3856_v13 = vld [vmem:[%s5291_s3 + $0x5c4] ss:$16 sps:$4 sm:$0xff]  }
  0x7c   :  { %1336 = vmatprep.subr.bf16.mxu0 %v3766_v14  ;;  %1459 = vmatprep.subr.bf16.mxu1 %v3769_v15  ;;  %v3859_v14 = vld [vmem:[%s5291_s3 + $0x5cc] ss:$16 sps:$4 sm:$0xff]   ;;  %v3854_v15 = vld [vmem:[%s5291_s3 + $0x5c0] ss:$16 sps:$4 sm:$0xff]  }
  0x7f   :  { %1337 = vmatpush1.bf16.msra.mxu0 %v3764_v17  ;;  %1460 = vmatpush1.bf16.msra.mxu1 %v3767_v20  ;;  %v3857_v17 = vld [vmem:[%s5291_s3 + $0x5c8] ss:$16 sps:$4 sm:$0xff]   ;;  %v3862_v20 = vld [vmem:[%s5291_s3 + $0x5e4] ss:$16 sps:$4 sm:$0xff]  }
  0x80   :  { %1347 = vmatprep.subr.bf16.mxu0 %v3772_v21  ;;  %1470 = vmatprep.subr.bf16.mxu1 %v3775_v22  ;;  %v3865_v21 = vld [vmem:[%s5291_s3 + $0x5ec] ss:$16 sps:$4 sm:$0xff]   ;;  %v3860_v22 = vld [vmem:[%s5291_s3 + $0x5e0] ss:$16 sps:$4 sm:$0xff]  }
  0x82   :  { %1339 = vmatmul.mubr.bf16.vlgmr.msra.gmra.mrb[0].mxu0 %v297_v24  ;;  %1462 = vmatmul.mubr.bf16.vlgmr.msra.gmra.mrb[0].mxu1 %v297_v24  ;;  %v3869_v24 = vld [vmem:[%s5292_s4 + $0x4] ss:$8 sps:$4 sm:$0xff]  }
  0x83   :  { %1348 = vmatpush1.bf16.msra.mxu0 %v3770_v23  ;;  %1471 = vmatpush1.bf16.msra.mxu1 %v3773_v25  ;;  %v3863_v23 = vld [vmem:[%s5291_s3 + $0x5e8] ss:$16 sps:$4 sm:$0xff]  }
  0x84   :  { %1349 = vmatprep.subr.bf16.mxu0 %v3778_v26  ;;  %1472 = vmatprep.subr.bf16.mxu1 %v3781_v27  ;;  %v3867_v25 = vld [vmem:[%s5292_s4] ss:$8 sps:$4 sm:$0xff]   ;;  %v3872_v26 = vld [vmem:[%s5292_s4 + $0x14] ss:$8 sps:$4 sm:$0xff]   ;;  %v3870_v27 = vld [vmem:[%s5292_s4 + $0x10] ss:$8 sps:$4 sm:$0xff]  }
  0x85   :  { %1379 = vmatprep.mubr.bf16.mxu0 %v4357_v18  ;;  %1502 = vmatprep.mubr.bf16.mxu1 %v4357_v18  ;;  %v3793_v18 = vld [vmem:[%s5291_s3 + $0x46c] ss:$16 sps:$4 sm:$0xff]  }
  0x87   :  { %1350 = vmatpush1.bf16.msra.mxu0 %v3776_v16  ;;  %1473 = vmatpush1.bf16.msra.mxu1 %v3779_v28  ;;  %v3875_v16 = vld [vmem:[%s5292_s4 + $0x24] ss:$8 sps:$4 sm:$0xff]   ;;  %v3873_v28 = vld [vmem:[%s5292_s4 + $0x20] ss:$8 sps:$4 sm:$0xff]  }
  0x88   :  { %1351 = vmatprep.subr.bf16.mxu0 %v3784_v29  ;;  %1474 = vmatprep.subr.bf16.mxu1 %v3787_v30  ;;  %v3878_v29 = vld [vmem:[%s5292_s4 + $0x34] ss:$8 sps:$4 sm:$0xff]  }
  0x8b   :  { %1352 = vmatpush1.bf16.msra.mxu0 %v3782_v31  ;;  %1475 = vmatpush1.bf16.msra.mxu1 %v3785_v32 }
  0x8c   :  { %1353 = vmatprep.subr.bf16.mxu0 %v3790_v33  ;;  %1476 = vmatprep.subr.bf16.mxu1 %v3793_v18 }
  0x8f   :  { %1354 = vmatpush1.bf16.msra.mxu0 %v3788_v34  ;;  %1477 = vmatpush1.bf16.msra.mxu1 %v3791_v35 }
  0x90   :  { %1355 = vmatprep.subr.bf16.mxu0 %v3796_v36  ;;  %1478 = vmatprep.subr.bf16.mxu1 %v3799_v37 }
  0x93   :  { %1356 = vmatpush1.bf16.msra.mxu0 %v3794_v38  ;;  %1479 = vmatpush1.bf16.msra.mxu1 %v3797_v39 }
  0x94   :  { %1357 = vmatprep.subr.bf16.mxu0 %v3802_v40  ;;  %1480 = vmatprep.subr.bf16.mxu1 %v3805_v41 }
  0x97   :  { %1358 = vmatpush1.bf16.msra.mxu0 %v3800_v43  ;;  %1481 = vmatpush1.bf16.msra.mxu1 %v3803_v44 }
  0x98   :  { %1359 = vmatprep.subr.bf16.mxu0 %v3808_v45  ;;  %1482 = vmatprep.subr.bf16.mxu1 %v3811_v46 }
  0x9b   :  { %1360 = vmatpush1.bf16.msra.mxu0 %v3806_v47  ;;  %1483 = vmatpush1.bf16.msra.mxu1 %v3809_v48 }
  0x9c   :  { %1361 = vmatprep.subr.bf16.mxu0 %v3814_v49  ;;  %1484 = vmatprep.subr.bf16.mxu1 %v3817_v50 }
  0x9f   :  { %1362 = vmatpush1.bf16.msra.mxu0 %v3812_v51  ;;  %1485 = vmatpush1.bf16.msra.mxu1 %v3815_v52 }
  0xa0   :  { %1363 = vmatprep.subr.bf16.mxu0 %v3820_v53  ;;  %1486 = vmatprep.subr.bf16.mxu1 %v3823_v54 }
  0xa3   :  { %1364 = vmatpush1.bf16.msra.mxu0 %v3818_v55  ;;  %1487 = vmatpush1.bf16.msra.mxu1 %v3821_v56 }
  0xa4   :  { %1365 = vmatprep.subr.bf16.mxu0 %v3826_v57  ;;  %1488 = vmatprep.subr.bf16.mxu1 %v3829_v58 }
  0xa7   :  { %1366 = vmatpush1.bf16.msra.mxu0 %v3824_v59  ;;  %1489 = vmatpush1.bf16.msra.mxu1 %v3827_v60 }
  0xa8   :  { %1367 = vmatprep.subr.bf16.mxu0 %v3832_v61  ;;  %1490 = vmatprep.subr.bf16.mxu1 %v3835_v62 }
  0xab   :  { %1368 = vmatpush1.bf16.msra.mxu0 %v3830_v63  ;;  %1491 = vmatpush1.bf16.msra.mxu1 %v3833_v0 }
  0xac   :  { %1369 = vmatprep.subr.bf16.mxu0 %v3838_v1  ;;  %1492 = vmatprep.subr.bf16.mxu1 %v3841_v2 }
  0xaf   :  { %1370 = vmatpush1.bf16.msra.mxu0 %v3836_v3  ;;  %1493 = vmatpush1.bf16.msra.mxu1 %v3839_v4 }
  0xb0   :  { %1371 = vmatprep.subr.bf16.mxu0 %v3844_v5  ;;  %1494 = vmatprep.subr.bf16.mxu1 %v3847_v6 }
  0xb3   :  { %1372 = vmatpush1.bf16.msra.mxu0 %v3842_v7  ;;  %1495 = vmatpush1.bf16.msra.mxu1 %v3845_v8 }
  0xb4   :  { %1373 = vmatprep.subr.bf16.mxu0 %v3850_v9  ;;  %1496 = vmatprep.subr.bf16.mxu1 %v3853_v10 }
  0xb7   :  { %1374 = vmatpush1.bf16.msra.mxu0 %v3848_v11  ;;  %1497 = vmatpush1.bf16.msra.mxu1 %v3851_v12 }
  0xb8   :  { %1375 = vmatprep.subr.bf16.mxu0 %v3856_v13  ;;  %1498 = vmatprep.subr.bf16.mxu1 %v3859_v14 }
  0xbb   :  { %1376 = vmatpush1.bf16.msra.mxu0 %v3854_v15  ;;  %1499 = vmatpush1.bf16.msra.mxu1 %v3857_v17 }
  0xbc   :  { %1377 = vmatprep.subr.bf16.mxu0 %v3862_v20  ;;  %1500 = vmatprep.subr.bf16.mxu1 %v3865_v21 }
  0xbf   :  { %1378 = vmatpush1.bf16.msra.mxu0 %v3860_v22  ;;  %1501 = vmatpush1.bf16.msra.mxu1 %v3863_v23 }
  0xc0   :  { %1945 = vmatprep.subr.bf16.mxu0 %v3869_v24 }
  0xc2   :  { %1380 = vmatmul.mubr.bf16.vlgmr.msra.gmra.mrb[0].mxu0 %v4359_v19  ;;  %1503 = vmatmul.mubr.bf16.vlgmr.msra.gmra.mrb[0].mxu1 %v4359_v19 }
  0xc3   :  { %1946 = vmatpush1.bf16.msra.mxu0 %v3867_v25 }
  0xc4   :  { %1947 = vmatprep.subr.bf16.mxu0 %v3872_v26 }
  0xc7   :  { %1948 = vmatpush1.bf16.msra.mxu0 %v3870_v27 }
  0xc8   :  { %1949 = vmatprep.subr.bf16.mxu0 %v3875_v16 }
  0xc9   :  { %18 = vsyncpa [#allocation5], 0  ;;  %v3876_v19 = vld [vmem:[%s5292_s4 + $0x30] ss:$8 sps:$4 sm:$0xff]   ;;  %v3881_v30 = vld [vmem:[%s5292_s4 + $0x44] ss:$8 sps:$4 sm:$0xff]  }
  0xca   :  { %v3879_v31 = vld [vmem:[%s5292_s4 + $0x40] ss:$8 sps:$4 sm:$0xff]   ;;  %v3884_v32 = vld [vmem:[%s5292_s4 + $0x54] ss:$8 sps:$4 sm:$0xff]   ;;  %v3882_v33 = vld [vmem:[%s5292_s4 + $0x50] ss:$8 sps:$4 sm:$0xff]  }
  0xcb   :  { %1950 = vmatpush1.bf16.msra.mxu0 %v3873_v28  ;;  %v3887_v18 = vld [vmem:[%s5292_s4 + $0x64] ss:$8 sps:$4 sm:$0xff]   ;;  %v3885_v34 = vld [vmem:[%s5292_s4 + $0x60] ss:$8 sps:$4 sm:$0xff]   ;;  %v3890_v35 = vld [vmem:[%s5292_s4 + $0x74] ss:$8 sps:$4 sm:$0xff]  }
  0xcc   :  { %1951 = vmatprep.subr.bf16.mxu0 %v3878_v29  ;;  %v3888_v36 = vld [vmem:[%s5292_s4 + $0x70] ss:$8 sps:$4 sm:$0xff]   ;;  %v3893_v37 = vld [vmem:[%s5292_s4 + $0x84] ss:$8 sps:$4 sm:$0xff]   ;;  %v3891_v38 = vld [vmem:[%s5292_s4 + $0x80] ss:$8 sps:$4 sm:$0xff]  }
  0xcd   :  { %v3896_v39 = vld [vmem:[%s5292_s4 + $0x94] ss:$8 sps:$4 sm:$0xff]   ;;  %v3894_v40 = vld [vmem:[%s5292_s4 + $0x90] ss:$8 sps:$4 sm:$0xff]   ;;  %v3899_v41 = vld [vmem:[%s5292_s4 + $0xa4] ss:$8 sps:$4 sm:$0xff]  }
  0xce   :  { %v3897_v43 = vld [vmem:[%s5292_s4 + $0xa0] ss:$8 sps:$4 sm:$0xff]   ;;  %v3902_v44 = vld [vmem:[%s5292_s4 + $0xb4] ss:$8 sps:$4 sm:$0xff]   ;;  %v3900_v45 = vld [vmem:[%s5292_s4 + $0xb0] ss:$8 sps:$4 sm:$0xff]  }
  0xcf   :  { %1952 = vmatpush1.bf16.msra.mxu0 %v3876_v19  ;;  %v3905_v46 = vld [vmem:[%s5292_s4 + $0xc4] ss:$8 sps:$4 sm:$0xff]   ;;  %v3903_v47 = vld [vmem:[%s5292_s4 + $0xc0] ss:$8 sps:$4 sm:$0xff]   ;;  %v3908_v48 = vld [vmem:[%s5292_s4 + $0xd4] ss:$8 sps:$4 sm:$0xff]  }
  0xd0   :  { %1953 = vmatprep.subr.bf16.mxu0 %v3881_v30  ;;  %v3906_v49 = vld [vmem:[%s5292_s4 + $0xd0] ss:$8 sps:$4 sm:$0xff]   ;;  %v3911_v50 = vld [vmem:[%s5292_s4 + $0xe4] ss:$8 sps:$4 sm:$0xff]   ;;  %v3909_v51 = vld [vmem:[%s5292_s4 + $0xe0] ss:$8 sps:$4 sm:$0xff]  }
  0xd1   :  { %v3914_v52 = vld [vmem:[%s5292_s4 + $0xf4] ss:$8 sps:$4 sm:$0xff]   ;;  %v3912_v53 = vld [vmem:[%s5292_s4 + $0xf0] ss:$8 sps:$4 sm:$0xff]   ;;  %v3917_v54 = vld [vmem:[%s5292_s4 + $0x104] ss:$8 sps:$4 sm:$0xff]  }
  0xd2   :  { %v3963_v55 = vld [vmem:[%s5293_s5 + $0x40] sm:$0xff]   ;;  %v3965_v57 = vld [vmem:[%s5293_s5 + $0x48] sm:$0xff]   ;;  %v3967_v59 = vld [vmem:[%s5293_s5 + $0x50] sm:$0xff]   ;;  %v233_v3 = vsub.s32 0, %v4262_v42  ;;  %v241_v4 = vsub.s32 2, %v4262_v42  ;;  %v237_v6 = vsub.s32 1, %v4262_v42 }
  0xd3   :  { %1954 = vmatpush1.bf16.msra.mxu0 %v3879_v31  ;;  %v3964_v56 = vld [vmem:[%s5293_s5] sm:$0xff]   ;;  %3342 = vmatprep.subr.bf16.mxu1 %v3963_v55  ;;  %v3966_v58 = vld [vmem:[%s5293_s5 + $0x8] sm:$0xff]   ;;  %v3968_v60 = vld [vmem:[%s5293_s5 + $0x10] sm:$0xff]   ;;  %v245_v7 = vsub.s32 3, %v4262_v42  ;;  %v4076_v8 = vmov 1983009808  }
  0xd4   :  { %1955 = vmatprep.subr.bf16.mxu0 %v3884_v32  ;;  %3343 = vmatpush3.bf16.msra.mxu1 %v3964_v56  ;;  %v3969_v61 = vld [vmem:[%s5293_s5 + $0x58] sm:$0xff]   ;;  %v3971_v63 = vld [vmem:[%s5293_s5 + $0x60] sm:$0xff]   ;;  %v3973_v1 = vld [vmem:[%s5293_s5 + $0x68] sm:$0xff]   ;;  %v1522_v9 = vunpack.c.l.s4 %v4076_v8  ;;  %vm1537_vm0 = vcmask 1041408   ;;  %vm1538_vm1 = vcmask 1043458   ;;  %vm1540_vm3 = vcmask 1045508  }
  0xd5   :  { %3344 = vmatprep.subr.bf16.mxu1 %v3965_v57  ;;  %v3970_v62 = vld [vmem:[%s5293_s5 + $0x18] sm:$0xff]   ;;  %v3972_v0 = vld [vmem:[%s5293_s5 + $0x20] sm:$0xff]   ;;  %v3974_v2 = vld [vmem:[%s5293_s5 + $0x28] sm:$0xff]   ;;  %vm1542_vm5 = vcmask 64518   ;;  %vm2040_vm7 = vcmask 125954   ;;  %vm4082_vm9 = vmmov 0  }
  0xd6   :  { %v229_v5 = vld [vmem:[%s5295_s7] sm:$0xf]  ;;  %v1523_v17 = vunpack.c.0.s8 %v1522_v9  ;;  %vm1539_vm2 = vmor %vm1538_vm1, %vm1537_vm0  ;;  %v3936_v55 = vld [vmem:[%s5292_s4 + $0x170] ss:$8 sps:$4 sm:$0xff]   ;;  %vm2334_vm10 = vcmask 254976   ;;  %s4083_s13 = smov [#allocation4]  }
  0xd7   :  { %1956 = vmatpush1.bf16.msra.mxu0 %v3882_v33  ;;  %v234_v10 = vrot.slane %v229_v5, %v233_v3  ;;  %v242_v11 = vrot.slane %v229_v5, %v241_v4  ;;  %v238_v12 = vrot.slane %v229_v5, %v237_v6  ;;  %v246_v13 = vrot.slane %v229_v5, %v245_v7  ;;  %vm1541_vm4 = vmor %vm1540_vm3, %vm1539_vm2  ;;  %v3941_v56 = vld [vmem:[%s5292_s4 + $0x184] ss:$8 sps:$4 sm:$0xff]   ;;  %v3939_v57 = vld [vmem:[%s5292_s4 + $0x180] ss:$8 sps:$4 sm:$0xff]   ;;  %s2990_s3 = sshll.u32 %s4083_s13, 4  ;;  %s2991_s3 = int_to_ptr.vmem [resolvable:$true] %s2990_s3 }
  0xd8   :  { %1957 = vmatprep.subr.bf16.mxu0 %v3887_v18  ;;  %3345 = vmatpush3.bf16.msra.mxu1 %v3966_v58  ;;  %v4891_v31 = vsub.s32 %v1523_v17, %v4262_v42  ;;  %vm1543_vm6 = vmor %vm1542_vm5, %vm1541_vm4  ;;  %v3944_v58 = vld [vmem:[%s5292_s4 + $0x194] ss:$8 sps:$4 sm:$0xff]   ;;  %v3954_v4 = vld [vmem:[%s5292_s4 + $0x1d0] ss:$8 sps:$4 sm:$0xff]   ;;  %s4027_s14 = scalar_lea.vmem %s2991_s3, 32  ;;  %p4032_p1 = scmp.lt.s32.totalorder %s2991_s3, %s2991_s3 }
  0xd9   :  { %3346 = vmatprep.subr.bf16.mxu1 %v3967_v59  ;;  %v3942_v59 = vld [vmem:[%s5292_s4 + $0x190] ss:$8 sps:$4 sm:$0xff]   ;;  %v3959_v5 = vld [vmem:[%s5292_s4 + $0x1e4] ss:$8 sps:$4 sm:$0xff]   ;;  %v3957_v7 = vld [vmem:[%s5292_s4 + $0x1e0] ss:$8 sps:$4 sm:$0xff]   ;;  %p4028_p0 = scmp.ne.s32.totalorder %s2991_s3, %s4027_s14  ;;  %p4033_p2 = scmp.lt.s32.totalorder %s4027_s14, %s4027_s14 }
  0xda   :  { %v3962_v8 = vld [vmem:[%s5292_s4 + $0x1f4] ss:$8 sps:$4 sm:$0xff]   ;;  %v3960_v9 = vld [vmem:[%s5292_s4 + $0x1f0] ss:$8 sps:$4 sm:$0xff]   ;;  %v2472_v17 = vld [vmem:[%s5290_s2] sm:$0x3] }
  0xdb   :  { %1958 = vmatpush1.bf16.msra.mxu0 %v3885_v34  ;;  %vm2041_vm8 = vmor %vm2040_vm7, %vm1537_vm0  ;;  %p4034_p3 = por %p4033_p2, %p4032_p1 }
  0xdc   :  { %1959 = vmatprep.subr.bf16.mxu0 %v3890_v35  ;;  %3347 = vmatpush3.bf16.msra.mxu1 %v3968_v60  ;;  %v3915_v35 = vld [vmem:[%s5292_s4 + $0x100] ss:$8 sps:$4 sm:$0xff]   ;;  %v3947_v60 = vld [vmem:[%s5292_s4 + $0x1a4] ss:$8 sps:$4 sm:$0xff]  }
  0xdd   :  { %3348 = vmatprep.subr.bf16.mxu1 %v3969_v61  ;;  %v3945_v61 = vld [vmem:[%s5292_s4 + $0x1a0] ss:$8 sps:$4 sm:$0xff]   ;;  %p4035_p4 = pnand %p4034_p3, %p4028_p0 }
  0xdf   :  { %1960 = vmatpush1.bf16.msra.mxu0 %v3888_v36 }
  0xe0   :  { %1961 = vmatprep.subr.bf16.mxu0 %v3893_v37  ;;  %3349 = vmatpush3.bf16.msra.mxu1 %v3970_v62  ;;  %v3920_v37 = vld [vmem:[%s5292_s4 + $0x114] ss:$8 sps:$4 sm:$0xff]  }
  0xe1   :  { %3350 = vmatprep.subr.bf16.mxu1 %v3971_v63  ;;  %v3950_v62 = vld [vmem:[%s5292_s4 + $0x1b4] ss:$8 sps:$4 sm:$0xff]   ;;  %v3948_v63 = vld [vmem:[%s5292_s4 + $0x1b0] ss:$8 sps:$4 sm:$0xff]  }
  0xe3   :  { %1962 = vmatpush1.bf16.msra.mxu0 %v3891_v38 }
  0xe4   :  { %1963 = vmatprep.subr.bf16.mxu0 %v3896_v39  ;;  %3351 = vmatpush3.bf16.msra.mxu1 %v3972_v0  ;;  %v3953_v0 = vld [vmem:[%s5292_s4 + $0x1c4] ss:$8 sps:$4 sm:$0xff]  }
  0xe5   :  { %3352 = vmatprep.subr.bf16.mxu1 %v3973_v1  ;;  %v3951_v1 = vld [vmem:[%s5292_s4 + $0x1c0] ss:$8 sps:$4 sm:$0xff]  }
  0xe7   :  { %1964 = vmatpush1.bf16.msra.mxu0 %v3894_v40 }
  0xe8   :  { %1965 = vmatprep.subr.bf16.mxu0 %v3899_v41  ;;  %3353 = vmatpush3.bf16.msra.mxu1 %v3974_v2  ;;  %v3956_v2 = vld [vmem:[%s5292_s4 + $0x1d4] ss:$8 sps:$4 sm:$0xff]  }
  0xeb   :  { %1966 = vmatpush1.bf16.msra.mxu0 %v3897_v43  ;;  %v3918_v43 = vld [vmem:[%s5292_s4 + $0x110] ss:$8 sps:$4 sm:$0xff]  }
  0xec   :  { %1967 = vmatprep.subr.bf16.mxu0 %v3902_v44  ;;  %v3923_v44 = vld [vmem:[%s5292_s4 + $0x124] ss:$8 sps:$4 sm:$0xff]  }
  0xef   :  { %1968 = vmatpush1.bf16.msra.mxu0 %v3900_v45  ;;  %v3921_v45 = vld [vmem:[%s5292_s4 + $0x120] ss:$8 sps:$4 sm:$0xff]  }
  0xf0   :  { %1969 = vmatprep.subr.bf16.mxu0 %v3905_v46  ;;  %v3926_v46 = vld [vmem:[%s5292_s4 + $0x134] ss:$8 sps:$4 sm:$0xff]  }
  0xf3   :  { %1970 = vmatpush1.bf16.msra.mxu0 %v3903_v47  ;;  %v3924_v47 = vld [vmem:[%s5292_s4 + $0x130] ss:$8 sps:$4 sm:$0xff]  }
  0xf4   :  { %1971 = vmatprep.subr.bf16.mxu0 %v3908_v48  ;;  %v3929_v48 = vld [vmem:[%s5292_s4 + $0x144] ss:$8 sps:$4 sm:$0xff]  }
  0xf7   :  { %1972 = vmatpush1.bf16.msra.mxu0 %v3906_v49  ;;  %v3927_v49 = vld [vmem:[%s5292_s4 + $0x140] ss:$8 sps:$4 sm:$0xff]  }
  0xf8   :  { %1973 = vmatprep.subr.bf16.mxu0 %v3911_v50  ;;  %v3932_v50 = vld [vmem:[%s5292_s4 + $0x154] ss:$8 sps:$4 sm:$0xff]  }
  0xfb   :  { %1974 = vmatpush1.bf16.msra.mxu0 %v3909_v51  ;;  %v3930_v51 = vld [vmem:[%s5292_s4 + $0x150] ss:$8 sps:$4 sm:$0xff]  }
  0xfc   :  { %1975 = vmatprep.subr.bf16.mxu0 %v3914_v52  ;;  %v3935_v52 = vld [vmem:[%s5292_s4 + $0x164] ss:$8 sps:$4 sm:$0xff]  }
  0xff   :  { %1976 = vmatpush1.bf16.msra.mxu0 %v3912_v53  ;;  %v3933_v53 = vld [vmem:[%s5292_s4 + $0x160] ss:$8 sps:$4 sm:$0xff]  }
 0x100   :  { %1986 = vmatprep.subr.bf16.mxu0 %v3917_v54  ;;  %v3938_v54 = vld [vmem:[%s5292_s4 + $0x174] ss:$8 sps:$4 sm:$0xff]  }
 0x195   :  { %v1381_v14 = vpop.f32.mrb[0].mxu0  ;;  %v1504_v15 = vpop.f32.mrb[0].mxu1 }
 0x196   :  { %v3538_v20 = vadd.f32 %v1381_v14, %v234_v10  ;;  %v3540_v21 = vadd.f32 %v1504_v15, %v242_v11  ;;  %v1383_v22 = vpop.f32.mrb[1].mxu0  ;;  %v1506_v23 = vpop.f32.mrb[1].mxu1  ;;  %v3975_v11 = vld [vmem:[%s5293_s5 + $0x70] sm:$0xff]   ;;  %v3978_v14 = vld [vmem:[%s5293_s5 + $0x38] sm:$0xff]   ;;  %v2336_v15 = vld [vmem:[%s5289_s1] sm:$0x3] }
 0x197   :  { %v3539_v24 = vadd.f32 %v1383_v22, %v238_v12  ;;  %v3541_v25 = vadd.f32 %v1506_v23, %v246_v13  ;;  %v1385_v26 = vpop.f32.mrb[2].mxu0  ;;  %v1508_v27 = vpop.f32.mrb[2].mxu1  ;;  %v3976_v12 = vld [vmem:[%s5293_s5 + $0x30] sm:$0xff]   ;;  %3354 = vmatprep.subr.bf16.mxu1 %v3975_v11  ;;  %v3977_v13 = vld [vmem:[%s5293_s5 + $0x78] sm:$0xff]   ;;  %v4079_v22 = vmov 0.0   ;;  %v4080_v23 = vmov 2  }
 0x198   :  { %v1511_v16 = vmax.f32 %v3538_v20, 0.0  ;;  %v4887_v28 = vmax.f32 %v3540_v21, 0.0  ;;  %v1386_v29 = vpop.f32.mrb[3].mxu0  ;;  %v1509_v19 = vpop.f32.mrb[3].mxu1  ;;  %3355 = vmatpush3.bf16.msra.mxu1 %v3976_v12  ;;  %v4077_v20 = vmov 0   ;;  %v4078_v21 = vmov 1  }
 0x199   :  { %v1512_v30 = vmax.f32 %v3539_v24, 0.0  ;;  %v1514_v32 = vmax.f32 %v3541_v25, 0.0  ;;  %3356 = vmatprep.subr.bf16.mxu1 %v3977_v13  ;;  %3574 = vset.pattern.permute.xlu0 %v4077_v20  ;;  %v4081_v24 = vmov 3   ;;  %v1613_v25 = vld [vmem:[%s5295_s7 + $0x4] sm:$0x3] }
 0x19a   :  { %v1609_v36 = vpack.c.bf16 %v1511_v16, %v1511_v16  ;;  %v1611_v10 = vpack.c.bf16 %v4887_v28, %v4887_v28  ;;  %3575 = vset.pattern.permute.xlu1 %v4078_v21  ;;  %2340 = vperm.xlu0 %3574, %v2336_v15   ;;  %v1618_v26 = vrot.slane %v1613_v25, %v233_v3  ;;  %v3980_v3 = vld [vmem:[%s5294_s6 + $0x30] ss:$24 sps:$4 sm:$0xff]   ;;  %v3305_v12 = vld [vmem:[%s5295_s7 + $0xc] ss:$0 sm:$0xff]  ;;  %v3304_v13 = vld [vmem:[%s5295_s7 + $0xf] ss:$0 sm:$0xff] }
 0x19b   :  { %v1519_v33 = vcombine.low %v1511_v16, %v1512_v30  ;;  %v1610_v18 = vpack.c.bf16 %v1512_v30, %v1512_v30  ;;  %v1520_v34 = vcombine.low %v4887_v28, %v1514_v32  ;;  %v1612_v40 = vpack.c.bf16 %v1514_v32, %v1514_v32  ;;  %2496 = vperm.xlu1 %3575, %v2472_v17   ;;  %v3306_v20 = vld [vmem:[%s5295_s7 + $0xd] ss:$0 sm:$0xff] }
 0x19c   :  { %3357 = vmatpush3.bf16.msra.mxu1 %v3978_v14  ;;  %v1622_v27 = vrot.slane %v1613_v25, %v237_v6  ;;  %v3981_v6 = vld [vmem:[%s5294_s6 + $0x60] ss:$24 sps:$4 sm:$0xff]  }
 0x19d   :  { %v1527_v38 = vrot.slane %v1519_v33, %v4891_v31  ;;  %v1534_v39 = vrot.slane %v1520_v34, %v4891_v31  ;;  %1977 = vmatprep.mubr.bf16.mxu0 %v1610_v18  ;;  %3418 = vmatprep.subr.bf16.mxu1 %v4079_v22  ;;  %v3998_v14 = vld [vmem:[%s5294_s6 + $0x98] ss:$24 sps:$4 sm:$0xff]  }
 0x19e   :  { %1978 = vmatmul.mubr.bf16.vlgmr.msra.gmra.mrb[4].mxu0 %v1609_v36  ;;  %2477 = vperm.xlu0 %3574, %v2472_v17   ;;  %v3979_v36 = vld [vmem:[%s5294_s6] ss:$24 sps:$4 sm:$0xff]  }
 0x19f   :  { %v1535_v41 = vcombine.low %v1527_v38, %v1534_v39  ;;  %1987 = vmatpush1.bf16.msra.mxu0 %v3915_v35  ;;  %2018 = vmatprep.mubr.bf16.mxu0 %v1612_v40  ;;  %v3983_v38 = vld [vmem:[%s5294_s6 + $0xc0] ss:$24 sps:$4 sm:$0xff]   ;;  %v3984_v39 = vld [vmem:[%s5294_s6 + $0xf0] ss:$24 sps:$4 sm:$0xff]  }
 0x1a0   :  { %1988 = vmatprep.subr.bf16.mxu0 %v3920_v37  ;;  %3576 = vset.pattern.permute.xlu1 %v4080_v23  ;;  %v3985_v40 = vld [vmem:[%s5294_s6 + $0x120] ss:$24 sps:$4 sm:$0xff]  }
 0x1a1   :  { %1544 = vst.msk [vmem:[%s5298_s10] sm:$0xff] %vm1543_vm6, %v1535_v41  ;;  %2509 = vperm.xlu1 %3576, %v2472_v17   ;;  %v3986_v41 = vld [vmem:[%s5294_s6 + $0x150] ss:$24 sps:$4 sm:$0xff]  }
 0x1a2   :  { %3577 = vset.pattern.permute.xlu0 %v4081_v24  ;;  %v3999_v23 = vld [vmem:[%s5294_s6 + $0xc8] ss:$24 sps:$4 sm:$0xff]  }
 0x1a3   :  { %1989 = vmatpush1.bf16.msra.mxu0 %v3918_v43  ;;  %2522 = vperm.xlu0 %3577, %v2472_v17  }
 0x1a4   :  { %1990 = vmatprep.subr.bf16.mxu0 %v3923_v44  ;;  %v3266_v44 = vld [vmem:[%s5295_s7 + $0x6] ss:$0 sm:$0xff] }
 0x1a7   :  { %1991 = vmatpush1.bf16.msra.mxu0 %v3921_v45 }
 0x1a8   :  { %1992 = vmatprep.subr.bf16.mxu0 %v3926_v46 }
 0x1ab   :  { %1993 = vmatpush1.bf16.msra.mxu0 %v3924_v47 }
 0x1ac   :  { %1994 = vmatprep.subr.bf16.mxu0 %v3929_v48 }
 0x1af   :  { %1995 = vmatpush1.bf16.msra.mxu0 %v3927_v49 }
 0x1b0   :  { %1996 = vmatprep.subr.bf16.mxu0 %v3932_v50 }
 0x1b3   :  { %1997 = vmatpush1.bf16.msra.mxu0 %v3930_v51  ;;  %v3987_v51 = vld [vmem:[%s5294_s6 + $0x4] ss:$24 sps:$4 sm:$0xff]  }
 0x1b4   :  { %1998 = vmatprep.subr.bf16.mxu0 %v3935_v52 }
 0x1b7   :  { %1999 = vmatpush1.bf16.msra.mxu0 %v3933_v53  ;;  %v3988_v53 = vld [vmem:[%s5294_s6 + $0x34] ss:$24 sps:$4 sm:$0xff]  }
 0x1b8   :  { %2000 = vmatprep.subr.bf16.mxu0 %v3938_v54  ;;  %v3989_v54 = vld [vmem:[%s5294_s6 + $0x64] ss:$24 sps:$4 sm:$0xff]  }
 0x1bb   :  { %2001 = vmatpush1.bf16.msra.mxu0 %v3936_v55  ;;  %v3990_v55 = vld [vmem:[%s5294_s6 + $0x94] ss:$24 sps:$4 sm:$0xff]  }
 0x1bc   :  { %2002 = vmatprep.subr.bf16.mxu0 %v3941_v56  ;;  %v3991_v56 = vld [vmem:[%s5294_s6 + $0xc4] ss:$24 sps:$4 sm:$0xff]  }
 0x1bf   :  { %2003 = vmatpush1.bf16.msra.mxu0 %v3939_v57  ;;  %v3292_v57 = vld [vmem:[%s5295_s7 + $0x8] ss:$0 sm:$0xff] }
 0x1c0   :  { %2004 = vmatprep.subr.bf16.mxu0 %v3944_v58 }
 0x1c3   :  { %2005 = vmatpush1.bf16.msra.mxu0 %v3942_v59 }
 0x1c4   :  { %2006 = vmatprep.subr.bf16.mxu0 %v3947_v60  ;;  %v3293_v60 = vld [vmem:[%s5295_s7 + $0x9] ss:$0 sm:$0xff] }
 0x1c7   :  { %2007 = vmatpush1.bf16.msra.mxu0 %v3945_v61  ;;  %v3992_v61 = vld [vmem:[%s5294_s6 + $0xf4] ss:$24 sps:$4 sm:$0xff]  }
 0x1c8   :  { %2008 = vmatprep.subr.bf16.mxu0 %v3950_v62 }
 0x1cb   :  { %2009 = vmatpush1.bf16.msra.mxu0 %v3948_v63  ;;  %v3993_v63 = vld [vmem:[%s5294_s6 + $0x124] ss:$24 sps:$4 sm:$0xff]  }
 0x1cc   :  { %2010 = vmatprep.subr.bf16.mxu0 %v3953_v0 }
 0x1cf   :  { %2011 = vmatpush1.bf16.msra.mxu0 %v3951_v1  ;;  %v3994_v1 = vld [vmem:[%s5294_s6 + $0x154] ss:$24 sps:$4 sm:$0xff]  }
 0x1d0   :  { %2012 = vmatprep.subr.bf16.mxu0 %v3956_v2 }
 0x1d3   :  { %2013 = vmatpush1.bf16.msra.mxu0 %v3954_v4  ;;  %v3995_v4 = vld [vmem:[%s5294_s6 + $0x8] ss:$24 sps:$4 sm:$0xff]  }
 0x1d4   :  { %2014 = vmatprep.subr.bf16.mxu0 %v3959_v5  ;;  %v3996_v5 = vld [vmem:[%s5294_s6 + $0x38] ss:$24 sps:$4 sm:$0xff]  }
 0x1d7   :  { %2015 = vmatpush1.bf16.msra.mxu0 %v3957_v7  ;;  %v3303_v7 = vld [vmem:[%s5295_s7 + $0xb] ss:$0 sm:$0xff] }
 0x1d8   :  { %2016 = vmatprep.subr.bf16.mxu0 %v3962_v8 }
 0x1db   :  { %2017 = vmatpush1.bf16.msra.mxu0 %v3960_v9 }
 0x1dc   :  { %3478 = vmatprep.subr.bf16.mxu0 %v4079_v22 }
 0x1de   :  { %2019 = vmatmul.mubr.bf16.vlgmr.msra.gmra.mrb[4].mxu0 %v1611_v10  ;;  %v3997_v10 = vld [vmem:[%s5294_s6 + $0x68] ss:$24 sps:$4 sm:$0xff]  }
 0x1df   :  { %3494 = vmatprep.mubr.msk.bf16.mxu0 %vm4082_vm9, %v4079_v22 }
 0x219   :  { %v2341_v58 = vpop.permute.xlu0 %2340 }
 0x21a   :  { %v2349_v59 = vmul.f32 %v3292_v57, %v2341_v58  ;;  %v2497_v9 = vpop.permute.xlu1 %2496 }
 0x21b   :  { %v2505_v15 = vmul.f32 %v3305_v12, %v2497_v9 }
 0x21c   :  { %v2357_v62 = vadd.f32 %v3293_v60, %v2349_v59 }
 0x21d   :  { %v2478_v8 = vpop.permute.xlu0 %2477 }
 0x21e   :  { %v2358_v0 = vmax.f32 %v2357_v62, 0.0  ;;  %v2486_v11 = vmul.f32 %v3303_v7, %v2478_v8  ;;  %v4019_v62 = vld [vmem:[%s5294_s6 + $0x14] ss:$24 sps:$4 sm:$0xff]   ;;  %v3308_v8 = vld [vmem:[%s5295_s7 + $0x10] ss:$0 sm:$0xff] }
 0x21f   :  { %v4025_v7 = vld [vmem:[%s5294_s6 + $0x134] ss:$24 sps:$4 sm:$0xff]  }
 0x220   :  { %v2375_v2 = vpack.c.bf16 %v2358_v0, %v2358_v0  ;;  %v2493_v17 = vadd.f32 %v3304_v13, %v2486_v11  ;;  %v2510_v21 = vpop.permute.xlu1 %2509  ;;  %v4020_v0 = vld [vmem:[%s5294_s6 + $0x44] ss:$24 sps:$4 sm:$0xff]  }
 0x221   :  { %v2518_v25 = vmul.f32 %v3306_v20, %v2510_v21 }
 0x222   :  { %v2506_v24 = vadd.f32 %v2505_v15, %v2493_v17 }
 0x2b1   :  { %v2020_v16 = vpop.f32.mrb[4].mxu0 }
 0x2b2   :  { %v3542_v28 = vadd.f32 %v2020_v16, %v1618_v26  ;;  %v2022_v29 = vpop.f32.mrb[5].mxu0  ;;  %v3307_v26 = vld [vmem:[%s5295_s7 + $0xe] ss:$0 sm:$0xff]  ;;  %v4000_v16 = vld [vmem:[%s5294_s6 + $0xf8] ss:$24 sps:$4 sm:$0xff]  }
 0x2b3   :  { %v3543_v19 = vadd.f32 %v2022_v29, %v1622_v27  ;;  %v2024_v30 = vpop.f32.mrb[6].mxu0  ;;  %v2523_v27 = vpop.permute.xlu0 %2522 }
 0x2b4   :  { %v2027_v32 = vmax.f32 %v3542_v28, 0.0  ;;  %v2025_v33 = vpop.f32.mrb[7].mxu0  ;;  %v2519_v28 = vadd.f32 %v2518_v25, %v2506_v24  ;;  %v2531_v29 = vmul.f32 %v3307_v26, %v2523_v27 }
 0x2b5   :  { %v2028_v18 = vmax.f32 %v3543_v19, 0.0  ;;  %v4001_v19 = vld [vmem:[%s5294_s6 + $0x128] ss:$24 sps:$4 sm:$0xff]  }
 0x2b6   :  { %v2075_v37 = vpack.c.bf16 %v2027_v32, %v2027_v32  ;;  %v2532_v30 = vadd.f32 %v2531_v29, %v2519_v28 }
 0x2b7   :  { %v2031_v34 = vcombine.low %v2027_v32, %v2028_v18  ;;  %v2076_v35 = vpack.c.bf16 %v2028_v18, %v2028_v18  ;;  %v4002_v32 = vld [vmem:[%s5294_s6 + $0x158] ss:$24 sps:$4 sm:$0xff]   ;;  %v4003_v18 = vld [vmem:[%s5294_s6 + $0xc] ss:$24 sps:$4 sm:$0xff]  }
 0x2b8   :  { %v2533_v33 = vmax.f32 %v2532_v30, 0.0 }
 0x2b9   :  { %v2038_v42 = vrot.slane %v2031_v34, %v4891_v31  ;;  %2212 = vmatprep.mubr.bf16.mxu1 %v2076_v35  ;;  %v3982_v31 = vld [vmem:[%s5294_s6 + $0x90] ss:$24 sps:$4 sm:$0xff]   ;;  %v4004_v35 = vld [vmem:[%s5294_s6 + $0x3c] ss:$24 sps:$4 sm:$0xff]  }
 0x2ba   :  { %2213 = vmatmul.mubr.bf16.vlgmr.msra.gmra.mrb[4].mxu1 %v2075_v37  ;;  %v2550_v34 = vpack.c.bf16 %v2533_v33, %v2533_v33  ;;  %v4006_v37 = vld [vmem:[%s5294_s6 + $0x9c] ss:$24 sps:$4 sm:$0xff]  }
 0x2bb   :  { %2042 = vst.msk [vmem:[%s5299_s11] sm:$0xf] %vm2041_vm8, %v2038_v42  ;;  %3419 = vmatpush3.bf16.msra.mxu1 %v3979_v36  ;;  %3434 = vmatprep.mubr.msk.bf16.mxu1 %vm4082_vm9, %v4079_v22  ;;  %v4005_v36 = vld [vmem:[%s5294_s6 + $0x6c] ss:$24 sps:$4 sm:$0xff]  }
 0x2bc   :  { %3420 = vmatprep.subr.bf16.mxu1 %v4079_v22  ;;  %v4007_v42 = vld [vmem:[%s5294_s6 + $0xcc] ss:$24 sps:$4 sm:$0xff]  }
 0x2bf   :  { %3421 = vmatpush3.bf16.msra.mxu1 %v3980_v3  ;;  %v4008_v3 = vld [vmem:[%s5294_s6 + $0xfc] ss:$24 sps:$4 sm:$0xff]  }
 0x2c0   :  { %3422 = vmatprep.subr.bf16.mxu1 %v4079_v22 }
 0x2c3   :  { %3423 = vmatpush3.bf16.msra.mxu1 %v3981_v6  ;;  %v4009_v6 = vld [vmem:[%s5294_s6 + $0x12c] ss:$24 sps:$4 sm:$0xff]  }
 0x2c4   :  { %3424 = vmatprep.subr.bf16.mxu1 %v4079_v22 }
 0x2c7   :  { %3425 = vmatpush3.bf16.msra.mxu1 %v3982_v31  ;;  %v4011_v31 = vld [vmem:[%s5294_s6 + $0x10] ss:$24 sps:$4 sm:$0xff]  }
 0x2c8   :  { %3426 = vmatprep.subr.bf16.mxu1 %v4079_v22  ;;  %3479 = vmatpush3.bf16.msra.mxu0 %v4011_v31 }
 0x2c9   :  { %3480 = vmatprep.subr.bf16.mxu0 %v4079_v22 }
 0x2cb   :  { %3427 = vmatpush3.bf16.msra.mxu1 %v3983_v38  ;;  %v4010_v38 = vld [vmem:[%s5294_s6 + $0x15c] ss:$24 sps:$4 sm:$0xff]  }
 0x2cc   :  { %3428 = vmatprep.subr.bf16.mxu1 %v4079_v22 }
 0x2cf   :  { %3429 = vmatpush3.bf16.msra.mxu1 %v3984_v39  ;;  %v4012_v39 = vld [vmem:[%s5294_s6 + $0x40] ss:$24 sps:$4 sm:$0xff]  }
 0x2d0   :  { %3430 = vmatprep.subr.bf16.mxu1 %v4079_v22  ;;  %3481 = vmatpush3.bf16.msra.mxu0 %v4012_v39 }
 0x2d1   :  { %3482 = vmatprep.subr.bf16.mxu0 %v4079_v22 }
 0x2d3   :  { %3431 = vmatpush3.bf16.msra.mxu1 %v3985_v40  ;;  %v4013_v40 = vld [vmem:[%s5294_s6 + $0x70] ss:$24 sps:$4 sm:$0xff]  }
 0x2d4   :  { %3432 = vmatprep.subr.bf16.mxu1 %v4079_v22  ;;  %3483 = vmatpush3.bf16.msra.mxu0 %v4013_v40 }
 0x2d5   :  { %3484 = vmatprep.subr.bf16.mxu0 %v4079_v22 }
 0x2d7   :  { %3433 = vmatpush3.bf16.msra.mxu1 %v3986_v41  ;;  %v4014_v41 = vld [vmem:[%s5294_s6 + $0xa0] ss:$24 sps:$4 sm:$0xff]  }
 0x2d8   :  { %3438 = vmatprep.subr.bf16.mxu1 %v4079_v22  ;;  %3485 = vmatpush3.bf16.msra.mxu0 %v4014_v41 }
 0x2d9   :  { %3486 = vmatprep.subr.bf16.mxu0 %v4079_v22 }
 0x38d   :  { %v3358_v43 = vpop.f32.mrb[4].mxu1 }
 0x38e   :  { %v3359_v45 = vpop.f32.mrb[5].mxu1 }
 0x38f   :  { %v3360_v46 = vadd.f32 %v3359_v45, %v3358_v43  ;;  %v3361_v47 = vpop.f32.mrb[6].mxu1  ;;  %v4015_v43 = vld [vmem:[%s5294_s6 + $0xd0] ss:$24 sps:$4 sm:$0xff]  }
 0x390   :  { %v3362_v48 = vpop.f32.mrb[7].mxu1  ;;  %3487 = vmatpush3.bf16.msra.mxu0 %v4015_v43  ;;  %v4017_v45 = vld [vmem:[%s5294_s6 + $0x130] ss:$24 sps:$4 sm:$0xff]   ;;  %v3283_v47 = vld [vmem:[%s5295_s7 + $0x7] ss:$0 sm:$0xff] }
 0x391   :  { %v2215_v49 = vadd.f32 %v3360_v46, %v3266_v44  ;;  %v4016_v44 = vld [vmem:[%s5294_s6 + $0x100] ss:$24 sps:$4 sm:$0xff]   ;;  %3488 = vmatprep.subr.bf16.mxu0 %v4079_v22 }
 0x392   :  { %v4018_v46 = vld [vmem:[%s5294_s6 + $0x160] ss:$24 sps:$4 sm:$0xff]  }
 0x393   :  { %v2220_v50 = vmax.f32 %v2215_v49, 0.0 }
 0x394   :  { %3489 = vmatpush3.bf16.msra.mxu0 %v4016_v44 }
 0x395   :  { %v2237_v52 = vpack.c.bf16 %v2220_v50, %v2220_v50  ;;  %3490 = vmatprep.subr.bf16.mxu0 %v4079_v22 }
 0x397   :  { %3435 = vmatmul.mubr.bf16.vlgmr.msra.gmra.mrb[8].mxu1 %v2237_v52 }
 0x398   :  { %3439 = vmatpush3.bf16.msra.mxu1 %v3987_v51  ;;  %3454 = vmatprep.mubr.msk.bf16.mxu1 %vm4082_vm9, %v4079_v22 }
 0x399   :  { %3440 = vmatprep.subr.bf16.mxu1 %v4079_v22  ;;  %3491 = vmatpush3.bf16.msra.mxu0 %v4017_v45 }
 0x39a   :  { %3492 = vmatprep.subr.bf16.mxu0 %v4079_v22 }
 0x39c   :  { %3441 = vmatpush3.bf16.msra.mxu1 %v3988_v53 }
 0x39d   :  { %3442 = vmatprep.subr.bf16.mxu1 %v4079_v22  ;;  %3493 = vmatpush3.bf16.msra.mxu0 %v4018_v46 }
 0x39e   :  { %3518 = vmatprep.subr.bf16.mxu0 %v4079_v22 }
 0x3a0   :  { %3443 = vmatpush3.bf16.msra.mxu1 %v3989_v54 }
 0x3a1   :  { %3444 = vmatprep.subr.bf16.mxu1 %v4079_v22 }
 0x3a4   :  { %3445 = vmatpush3.bf16.msra.mxu1 %v3990_v55  ;;  %v3294_v55 = vld [vmem:[%s5295_s7 + $0xa] ss:$0 sm:$0xff] }
 0x3a5   :  { %3446 = vmatprep.subr.bf16.mxu1 %v4079_v22 }
 0x3a8   :  { %3447 = vmatpush3.bf16.msra.mxu1 %v3991_v56 }
 0x3a9   :  { %3448 = vmatprep.subr.bf16.mxu1 %v4079_v22 }
 0x3ac   :  { %3449 = vmatpush3.bf16.msra.mxu1 %v3992_v61 }
 0x3ad   :  { %3450 = vmatprep.subr.bf16.mxu1 %v4079_v22 }
 0x3b0   :  { %3451 = vmatpush3.bf16.msra.mxu1 %v3993_v63 }
 0x3b1   :  { %3452 = vmatprep.subr.bf16.mxu1 %v4079_v22 }
 0x3b4   :  { %3453 = vmatpush3.bf16.msra.mxu1 %v3994_v1  ;;  %v4021_v1 = vld [vmem:[%s5294_s6 + $0x74] ss:$24 sps:$4 sm:$0xff]  }
 0x3b5   :  { %3458 = vmatprep.subr.bf16.mxu1 %v4079_v22 }
 0x3b7   :  { %3455 = vmatmul.mubr.bf16.vlgmr.msra.gmra.mrb[12].mxu1 %v2375_v2  ;;  %v4022_v2 = vld [vmem:[%s5294_s6 + $0xa4] ss:$24 sps:$4 sm:$0xff]  }
 0x3b8   :  { %3459 = vmatpush3.bf16.msra.mxu1 %v3995_v4  ;;  %3474 = vmatprep.mubr.msk.bf16.mxu1 %vm4082_vm9, %v4079_v22  ;;  %v4023_v4 = vld [vmem:[%s5294_s6 + $0xd4] ss:$24 sps:$4 sm:$0xff]  }
 0x3b9   :  { %3460 = vmatprep.subr.bf16.mxu1 %v4079_v22 }
 0x3bc   :  { %3461 = vmatpush3.bf16.msra.mxu1 %v3996_v5  ;;  %v4024_v5 = vld [vmem:[%s5294_s6 + $0x104] ss:$24 sps:$4 sm:$0xff]  }
 0x3bd   :  { %3462 = vmatprep.subr.bf16.mxu1 %v4079_v22 }
 0x3c0   :  { %3463 = vmatpush3.bf16.msra.mxu1 %v3997_v10  ;;  %v4026_v10 = vld [vmem:[%s5294_s6 + $0x164] ss:$24 sps:$4 sm:$0xff]  }
 0x3c1   :  { %3464 = vmatprep.subr.bf16.mxu1 %v4079_v22 }
 0x3c4   :  { %3465 = vmatpush3.bf16.msra.mxu1 %v3998_v14 }
 0x3c5   :  { %3466 = vmatprep.subr.bf16.mxu1 %v4079_v22 }
 0x3c8   :  { %3467 = vmatpush3.bf16.msra.mxu1 %v3999_v23 }
 0x3c9   :  { %3468 = vmatprep.subr.bf16.mxu1 %v4079_v22 }
 0x3cc   :  { %3469 = vmatpush3.bf16.msra.mxu1 %v4000_v16 }
 0x3cd   :  { %3470 = vmatprep.subr.bf16.mxu1 %v4079_v22 }
 0x3d0   :  { %3471 = vmatpush3.bf16.msra.mxu1 %v4001_v19 }
 0x3d1   :  { %3472 = vmatprep.subr.bf16.mxu1 %v4079_v22 }
 0x3d4   :  { %3473 = vmatpush3.bf16.msra.mxu1 %v4002_v32 }
 0x3d5   :  { %3498 = vmatprep.subr.bf16.mxu1 %v4079_v22 }
 0x3d7   :  { %3475 = vmatmul.mubr.bf16.vlgmr.msra.gmra.mrb[16].mxu1 %v2550_v34 }
 0x3d8   :  { %3499 = vmatpush3.bf16.msra.mxu1 %v4003_v18  ;;  %3514 = vmatprep.mubr.msk.bf16.mxu1 %vm4082_vm9, %v4079_v22 }
 0x3d9   :  { %3500 = vmatprep.subr.bf16.mxu1 %v4079_v22 }
 0x3dc   :  { %3501 = vmatpush3.bf16.msra.mxu1 %v4004_v35 }
 0x3dd   :  { %3502 = vmatprep.subr.bf16.mxu1 %v4079_v22 }
 0x3e0   :  { %3503 = vmatpush3.bf16.msra.mxu1 %v4005_v36 }
 0x3e1   :  { %3504 = vmatprep.subr.bf16.mxu1 %v4079_v22 }
 0x3e4   :  { %3505 = vmatpush3.bf16.msra.mxu1 %v4006_v37 }
 0x3e5   :  { %3506 = vmatprep.subr.bf16.mxu1 %v4079_v22 }
 0x3e8   :  { %3507 = vmatpush3.bf16.msra.mxu1 %v4007_v42 }
 0x3e9   :  { %3508 = vmatprep.subr.bf16.mxu1 %v4079_v22 }
 0x3ec   :  { %3509 = vmatpush3.bf16.msra.mxu1 %v4008_v3 }
 0x3ed   :  { %3510 = vmatprep.subr.bf16.mxu1 %v4079_v22 }
 0x3f0   :  { %3511 = vmatpush3.bf16.msra.mxu1 %v4009_v6 }
 0x3f1   :  { %3512 = vmatprep.subr.bf16.mxu1 %v4079_v22 }
 0x3f4   :  { %3513 = vmatpush3.bf16.msra.mxu1 %v4010_v38 }
 0x46a   :  { %v2327_v48 = vpop.f32.mrb[8].mxu1 }
 0x46b   :  { %v2328_v49 = vadd.f32 %v3283_v47, %v2327_v48  ;;  %v3436_v50 = vpop.f32.mrb[9].mxu1 }
 0x46c   :  { %v2330_v51 = vpop.f32.mrb[10].mxu1 }
 0x46d   :  { %v2333_v52 = vmax.f32 %v2328_v49, 0.0  ;;  %v3437_v53 = vpop.f32.mrb[11].mxu1 }
 0x46f   :  { %v2663_v54 = vpack.c.bf16 %v2333_v52, %v2333_v52  ;;  %2335 = vst.msk [vmem:[#allocation4] sm:$0x3] %vm2334_vm10, %v2333_v52 }
 0x471   :  { %3515 = vmatmul.mubr.bf16.vlgmr.msra.gmra.mrb[20].mxu1 %v2663_v54 }
 0x48a   :  { %v2465_v56 = vpop.f32.mrb[12].mxu1 }
 0x48b   :  { %v2466_v57 = vadd.f32 %v3294_v55, %v2465_v56  ;;  %v3456_v58 = vpop.f32.mrb[13].mxu1 }
 0x48c   :  { %v2468_v59 = vpop.f32.mrb[14].mxu1 }
 0x48d   :  { %v2471_v60 = vmax.f32 %v2466_v57, 0.0  ;;  %v3457_v61 = vpop.f32.mrb[15].mxu1 }
 0x48f   :  { %v2680_v63 = vpack.c.bf16 %v2471_v60, %v2471_v60 }
 0x491   :  { %3495 = vmatmul.mubr.bf16.vlgmr.msra.gmra.mrb[8].mxu0 %v2680_v63 }
 0x492   :  { %3519 = vmatpush3.bf16.msra.mxu0 %v4019_v62  ;;  %3534 = vmatprep.mubr.msk.bf16.mxu0 %vm4082_vm9, %v4079_v22 }
 0x493   :  { %3520 = vmatprep.subr.bf16.mxu0 %v4079_v22 }
 0x496   :  { %3521 = vmatpush3.bf16.msra.mxu0 %v4020_v0 }
 0x497   :  { %3522 = vmatprep.subr.bf16.mxu0 %v4079_v22 }
 0x49a   :  { %3523 = vmatpush3.bf16.msra.mxu0 %v4021_v1 }
 0x49b   :  { %3524 = vmatprep.subr.bf16.mxu0 %v4079_v22 }
 0x49e   :  { %3525 = vmatpush3.bf16.msra.mxu0 %v4022_v2 }
 0x49f   :  { %3526 = vmatprep.subr.bf16.mxu0 %v4079_v22 }
 0x4a2   :  { %3527 = vmatpush3.bf16.msra.mxu0 %v4023_v4 }
 0x4a3   :  { %3528 = vmatprep.subr.bf16.mxu0 %v4079_v22 }
 0x4a6   :  { %3529 = vmatpush3.bf16.msra.mxu0 %v4024_v5 }
 0x4a7   :  { %3530 = vmatprep.subr.bf16.mxu0 %v4079_v22 }
 0x4aa   :  { %v2640_v9 = vpop.f32.mrb[16].mxu1  ;;  %3531 = vmatpush3.bf16.msra.mxu0 %v4025_v7 }
 0x4ab   :  { %v2641_v11 = vadd.f32 %v3308_v8, %v2640_v9  ;;  %v3476_v12 = vpop.f32.mrb[17].mxu1  ;;  %3532 = vmatprep.subr.bf16.mxu0 %v4079_v22 }
 0x4ac   :  { %v2643_v13 = vpop.f32.mrb[18].mxu1 }
 0x4ad   :  { %v2646_v14 = vmax.f32 %v2641_v11, 0.0  ;;  %v3477_v15 = vpop.f32.mrb[19].mxu1 }
 0x4ae   :  { %3533 = vmatpush3.bf16.msra.mxu0 %v4026_v10 }
 0x4af   :  { %v2873_v17 = vpack.c.bf16 %v2646_v14, %v2646_v14 }
 0x4b1   :  { %3535 = vmatmul.mubr.bf16.vlgmr.msra.gmra.mrb[12].mxu0 %v2873_v17 }
 0x4b2   :  { %4038 = shalt.err (!%p4035_p4)
}
 0x4b3   :  { %s4039_s16 = scalar_lea.hbm %s5297_s9, 32 }
 0x4b4   :  { %p4040_p5 = scmp.ne.s32.totalorder %s5297_s9, %s4039_s16  ;;  %p4043_p6 = scmp.lt.u32.totalorder %s4039_s16, %s5297_s9 }
 0x4b6   :  { %p4045_p7 = pnand %p4043_p6, %p4040_p5 }
 0x4b8   :  { %4048 = shalt.err (!%p4045_p7)
}
 0x4b9   :  { %2993 = dma.vmem_to_hbm [thread:$0]  %s2991_s3, 32, %s5297_s9, [#allocation5]   ;;  %v3341_v29 = vld [vmem:[%s5295_s7 + $0x11] ss:$0 sm:$0xff]  ;;  %vm2972_vm11 = vcmask 517120  }
 0x4ba   :  { %s4084_s1 = smov [#allocation2]  }
 0x4bb   :  { %s2980_s2 = sshll.u32 %s4084_s1, 4  ;;  %s2981_s2 = int_to_ptr.vmem [resolvable:$true] %s2980_s2 }
 0x4bc   :  { %s4049_s9 = scalar_lea.vmem %s2981_s2, 32  ;;  %p4054_p9 = scmp.lt.s32.totalorder %s2981_s2, %s2981_s2 }
 0x4bd   :  { %p4050_p8 = scmp.ne.s32.totalorder %s2981_s2, %s4049_s9  ;;  %p4055_p10 = scmp.lt.s32.totalorder %s4049_s9, %s4049_s9 }
 0x4bf   :  { %p4056_p11 = por %p4055_p10, %p4054_p9 }
 0x4c1   :  { %p4057_p12 = pnand %p4056_p11, %p4050_p8 }
 0x544   :  { %v2851_v22 = vpop.f32.mrb[20].mxu1 }
 0x545   :  { %v3516_v20 = vpop.f32.mrb[21].mxu1 }
 0x546   :  { %v2854_v21 = vpop.f32.mrb[22].mxu1 }
 0x547   :  { %v3517_v23 = vpop.f32.mrb[23].mxu1 }
 0x564   :  { %v2763_v24 = vpop.f32.mrb[8].mxu0 }
 0x565   :  { %v2852_v25 = vadd.f32 %v2851_v22, %v2763_v24  ;;  %v3496_v26 = vpop.f32.mrb[9].mxu0 }
 0x566   :  { %v2766_v27 = vpop.f32.mrb[10].mxu0 }
 0x567   :  { %v3497_v16 = vpop.f32.mrb[11].mxu0 }
 0x584   :  { %v2956_v28 = vpop.f32.mrb[12].mxu0 }
 0x585   :  { %v2962_v19 = vadd.f32 %v2956_v28, %v2852_v25  ;;  %v3536_v30 = vpop.f32.mrb[13].mxu0 }
 0x586   :  { %v2959_v32 = vpop.f32.mrb[14].mxu0 }
 0x587   :  { %v2970_v33 = vadd.f32 %v3341_v29, %v2962_v19  ;;  %v3537_v18 = vpop.f32.mrb[15].mxu0 }
 0x589   :  { %v2971_v34 = vmax.f32 %v2970_v33, 0.0 }
 0x58b   :  { %2973 = vst.msk [vmem:[#allocation2] sm:$0x3] %vm2972_vm11, %v2971_v34 }
 0x58c   :  { %4060 = shalt.err (!%p4057_p12)
}
 0x58d   :  { %s4061_s0 = scalar_lea.hbm %s5296_s8, 32 }
 0x58e   :  { %p4062_p13 = scmp.ne.s32.totalorder %s5296_s8, %s4061_s0  ;;  %p4065_p0 = scmp.lt.u32.totalorder %s4061_s0, %s5296_s8 }
 0x590   :  { %p4067_p1 = pnand %p4065_p0, %p4062_p13 }
 0x592   :  { %4070 = shalt.err (!%p4067_p1)
}
 0x593   :  { %2983 = dma.vmem_to_hbm [thread:$0]  %s2981_s2, 32, %s5296_s8, [#allocation3]  }
 0x594   :  { %4071 = dma.done.wait [#allocation3], 32  }
 0x595   :  { %4072 = vsyncadd [#allocation3], 4294967264 }
 0x596   :  { %4073 = dma.done.wait [#allocation5], 32  }
 0x597   :  { %4074 = vsyncadd [#allocation5], 4294967264 }
 0x598   :  { %3008 = vsyncpa [#allocation3], 1 }
 0x599   :  { %3009 = vsyncpa [#allocation5], 1 }

</bundles_post_ra>
